<compile_context>
chip_gen: v7x
topology: tpu7x:2x2x1
jax: 0.10.0
libtpu: 0.0.40
codegen_flags: <defaults>
</compile_context>

<pallas_src>
import jax
import jax.numpy as jnp
import numpy as np
from jax import lax
from jax.experimental import pallas as pl
from jax.experimental.pallas import tpu as pltpu


# --------------------------------------------------------------------------
# Fused kernel: one (n, t) output frame per grid step, with a T-carry.
# --------------------------------------------------------------------------
def _make_fused_kernel(if_attn, has_al, T, H, W, Cin, Cmid, P, compute_dtype):
    HW = H * W
    # Wide channels: accumulate per-tap matmuls and skip the (HW, 9*Cin) concat.
    split_taps = Cin >= 128

    def kernel(*refs):
        # refs = (x_first, x_next, [attn_last], w1, wt, w2, bn_mid, bn_p,
        #         attn_scalars, out, attn, m_buf, id_buf, acc)
        xfirst_ref, xnext_ref = refs[0], refs[1]
        idx = 2
        if has_al:
            al_ref = refs[idx]
            idx += 1
        (w1_ref, wt_ref, w2_ref, bnm_ref, bnp_ref, ap_ref,
         out_ref, attn_ref, m_buf, id_buf, acc_ref) = refs[idx:idx + 11]

        t = pl.program_id(1)

        s_mid = bnm_ref[0:1, :]              # (1, Cmid) f32
        b_mid = bnm_ref[1:2, :]

        def spatial_bn_relu(frame):
            # frame: (H+2, W+2, Cin) in compute dtype.  conv1-spatial + BN + ReLU.
            if split_taps:
                m = None
                k = 0
                for dy in range(3):
                    for dx in range(3):
                        tap = frame[dy:dy + H, dx:dx + W, :].reshape(HW, Cin)
                        part = jnp.dot(tap, w1_ref[k * Cin:(k + 1) * Cin, :],
                                       preferred_element_type=jnp.float32)
                        m = part if m is None else m + part
                        k += 1
            else:
                taps = [frame[dy:dy + H, dx:dx + W, :].reshape(HW, Cin)
                        for dy in range(3) for dx in range(3)]
                patch = jnp.concatenate(taps, axis=-1)        # (HW, 9*Cin) bf16
                m = jnp.dot(patch, w1_ref[...],
                            preferred_element_type=jnp.float32)
            m = jnp.maximum(m * s_mid + b_mid, 0.0)           # BN(mid) + ReLU, f32
            return m.astype(compute_dtype)                    # quantize (matches ref)

        # ---- carry (re)init at the start of each temporal sequence --------
        @pl.when(t == 0)
        def _():
            x0 = xfirst_ref[...]                               # padded frame 0
            id_buf[0] = x0[1:1 + H, 1:1 + W, :].reshape(HW, Cin)
            m_buf[0] = spatial_bn_relu(x0)

        # ---- advance the carry: compute mid / identity for frame t+1 ------
        @pl.when(t < T - 1)
        def _():
            xn = xnext_ref[...]                                # padded frame t+1
            id_buf[lax.rem(t + 1, 2)] = xn[1:1 + H, 1:1 + W, :].reshape(HW, Cin)
            m_buf[lax.rem(t + 1, 3)] = spatial_bn_relu(xn)

        # ---- temporal (3,1,1) conv: 3 accumulating K=Cmid matmuls ---------
        acc_ref[...] = jnp.dot(m_buf[lax.rem(t, 3)], wt_ref[1],
                               preferred_element_type=jnp.float32)

        @pl.when(t > 0)                       # skip the zero-padded tap at t==0
        def _():
            acc_ref[...] += jnp.dot(m_buf[lax.rem(t + 2, 3)], wt_ref[0],
                                    preferred_element_type=jnp.float32)

        @pl.when(t < T - 1)                   # skip the zero-padded tap at t==T-1
        def _():
            acc_ref[...] += jnp.dot(m_buf[lax.rem(t + 1, 3)], wt_ref[2],
                                    preferred_element_type=jnp.float32)

        # ---- bn1 + relu -> conv2 -> bn2 -> +identity -> relu ---------------
        y = jnp.maximum(acc_ref[...] * bnp_ref[0:1, :] + bnp_ref[1:2, :], 0.0)
        z = jnp.dot(y.astype(compute_dtype), w2_ref[...],
                    preferred_element_type=jnp.float32)
        z = z * bnp_ref[2:3, :] + bnp_ref[3:4, :]

        identity = id_buf[lax.rem(t, 2)].astype(jnp.float32)   # (HW, Cin)
        o = jnp.maximum(z + identity, 0.0)                     # (HW, P) f32

        # ---- channel attention: mean/max over P, 1x1 conv + BN + sigmoid ---
        avg = jnp.mean(o, axis=-1, keepdims=True)              # (HW, 1)
        mx = jnp.max(o, axis=-1, keepdims=True)
        a = jax.nn.sigmoid((avg * ap_ref[0] + mx * ap_ref[1]) * ap_ref[2]
                           + ap_ref[3])
        if has_al:
            a = a * al_ref[...].reshape(HW, 1)                 # attn_last product

        attn_ref[...] = a.reshape(1, HW).astype(attn_ref.dtype)  # lane-dense store
        if if_attn:
            out_ref[...] = (o * a).astype(out_ref.dtype)
        else:
            out_ref[...] = o.astype(out_ref.dtype)

    return kernel


# --------------------------------------------------------------------------
# Wrapper: mirrors CABlock3D.forward((x, attn_last, if_attn)).
# --------------------------------------------------------------------------
def ca_block3d_forward(x_ncdhw, attn_last, if_attn, params, *,
                       compute_dtype=jnp.bfloat16, out_dtype=jnp.float32,
                       vmem_limit_mb=32):
    """x_ncdhw: (N, C, T, H, W) f32; attn_last: (N, 1, T, H, W) or None.

    Returns (out (N, P, T, H, W) out_dtype, attn (N, 1, T, H, W) f32, True).
    `compute_dtype` is the matmul-operand / carry-storage dtype (bf16 default;
    pass jnp.float32 for exact f32 semantics).  `out_dtype=jnp.bfloat16` halves
    writeback bandwidth (recommended on v5e).
    """
    w1 = params["w1"]          # (9, Cin, Cmid)
    wt = params["wt"]          # (3, Cmid, P)
    w2 = params["w2"]          # (P, P)
    bn_mid = params["bn_mid"]  # (2, Cmid) rows = [scale, bias]
    bn_p = params["bn_p"]      # (4, P)    rows = [scale1, bias1, scale2, bias2]
    attnp = params["attnp"]    # (4,)      [w_avg, w_max, attn_scale, attn_bias]

    N, C, T, H, W = x_ncdhw.shape
    Cin = C
    Cmid = w1.shape[-1]
    P = wt.shape[-1]
    assert C == P, "downsample=None path requires inplanes == planes"
    HW = H * W
    Hp, Wp = H + 2, W + 2
    cd = compute_dtype

    # Channels-last, spatial zero pad only (temporal boundary handled in-kernel
    # by skipping the boundary taps), stored in compute dtype.
    x = jnp.transpose(x_ncdhw, (0, 2, 3, 4, 1)).astype(cd)       # (N,T,H,W,C)
    xpad = jnp.pad(x, ((0, 0), (0, 0), (1, 1), (1, 1), (0, 0)))  # (N,T,Hp,Wp,C)

    w1f = w1.reshape(9 * Cin, Cmid).astype(cd)    # tap-major rows
    wt3 = wt.astype(cd)                           # (3, Cmid, P)
    w2c = w2.astype(cd)
    bn_mid = bn_mid.astype(jnp.float32)
    bn_p = bn_p.astype(jnp.float32)
    attnp = attnp.astype(jnp.float32)

    has_al = attn_last is not None

    in_specs = [
        # Frame 0 (constant block index along t -> DMA'd once per sample n).
        pl.BlockSpec((None, None, Hp, Wp, Cin), lambda n, t: (n, 0, 0, 0, 0)),
        # Frame t+1 (clamped at the end; unused at t == T-1).
        pl.BlockSpec((None, None, Hp, Wp, Cin),
                     lambda n, t: (n, jnp.minimum(t + 1, T - 1), 0, 0, 0)),
    ]
    args = [xpad, xpad]
    if has_al:
        # lane-dense attn_last: (N, T, 1, HW) f32
        al = jnp.transpose(attn_last, (0, 2, 1, 3, 4)).reshape(N, T, 1, HW)
        al = al.astype(jnp.float32)
        in_specs.append(pl.BlockSpec((None, None, 1, HW),
                                     lambda n, t: (n, t, 0, 0)))
        args.append(al)

    # Weights / folded BN: whole-array VMEM residents (single buffered,
    # not pipelined).  Attention scalars in SMEM.
    vmem_whole = pl.BlockSpec(memory_space=pltpu.MemorySpace.VMEM)
    in_specs += [vmem_whole, vmem_whole, vmem_whole, vmem_whole, vmem_whole,
                 pl.BlockSpec(memory_space=pltpu.MemorySpace.SMEM)]
    args += [w1f, wt3, w2c, bn_mid, bn_p, attnp]

    out_shape = (jax.ShapeDtypeStruct((N, T, HW, P), out_dtype),
                 jax.ShapeDtypeStruct((N, T, 1, HW), jnp.float32))
    out_specs = (pl.BlockSpec((None, None, HW, P), lambda n, t: (n, t, 0, 0)),
                 pl.BlockSpec((None, None, 1, HW), lambda n, t: (n, t, 0, 0)))

    scratch_shapes = [
        pltpu.VMEM((3, HW, Cmid), cd),        # mid carry (frames t-1, t, t+1)
        pltpu.VMEM((2, HW, Cin), cd),         # identity carry
        pltpu.VMEM((HW, P), jnp.float32),     # temporal-conv accumulator
    ]

    itemsize = jnp.dtype(cd).itemsize
    out_isz = jnp.dtype(out_dtype).itemsize
    flops = int(2 * N * T * HW * (9 * Cin * Cmid + 3 * Cmid * P + P * P))
    bytes_acc = int(
        N * T * (Hp * Wp * Cin * itemsize          # each x frame read once
                 + HW * P * out_isz                # out write
                 + HW * 4                          # attn write
                 + (HW * 4 if has_al else 0))      # attn_last read
        + (w1f.size + wt3.size + w2c.size) * itemsize
        + (bn_mid.size + bn_p.size + attnp.size) * 4)
    cost = pl.CostEstimate(flops=flops, transcendentals=int(N * T * HW),
                           bytes_accessed=bytes_acc)

    kernel = _make_fused_kernel(bool(if_attn), has_al, T, H, W, Cin, Cmid, P, cd)
    out, attn = pl.pallas_call(
        kernel,
        out_shape=out_shape,
        grid=(N, T),
        in_specs=in_specs,
        out_specs=out_specs,
        scratch_shapes=scratch_shapes,
        compiler_params=pltpu.CompilerParams(
            # N parallel (megacore / v7x 2-TC), T sequential (carry dependence).
            dimension_semantics=("parallel", "arbitrary"),
            vmem_limit_bytes=vmem_limit_mb * 1024 * 1024),
        cost_estimate=cost,
    )(*args)

    out_ncdhw = jnp.transpose(out.reshape(N, T, H, W, P), (0, 4, 1, 2, 3))
    attn_ncdhw = jnp.transpose(attn.reshape(N, T, 1, H, W), (0, 2, 1, 3, 4))
    return out_ncdhw, attn_ncdhw, True


# --------------------------------------------------------------------------
# Pure-JAX reference (same math, same bf16 quantization points) for checking.
# --------------------------------------------------------------------------
def reference_forward(x_ncdhw, attn_last, if_attn, params, *,
                      compute_dtype=jnp.bfloat16):
    w1, wt, w2 = params["w1"], params["wt"], params["w2"]
    bn_mid, bn_p, ap = params["bn_mid"], params["bn_p"], params["attnp"]
    N, C, T, H, W = x_ncdhw.shape
    Cmid, P = w1.shape[-1], wt.shape[-1]
    HW = H * W
    cd = compute_dtype

    x = jnp.transpose(x_ncdhw, (0, 2, 3, 4, 1)).astype(cd)        # storage quant
    xpad = jnp.pad(x, ((0, 0), (0, 0), (1, 1), (1, 1), (0, 0)))   # spatial pad
    taps = [xpad[:, :, dy:dy + H, dx:dx + W, :]
            for dy in range(3) for dx in range(3)]
    patch = jnp.concatenate(taps, axis=-1).reshape(N, T, HW, 9 * C)
    w1f = w1.reshape(9 * C, Cmid).astype(cd)
    mid = jnp.einsum("ntpk,km->ntpm", patch, w1f,
                     preferred_element_type=jnp.float32)
    mid = jnp.maximum(mid * bn_mid[0] + bn_mid[1], 0.0)

    midq = mid.astype(cd)
    mid_pad = jnp.pad(midq, ((0, 0), (1, 1), (0, 0), (0, 0)))     # temporal pad
    mid_cat = jnp.concatenate([mid_pad[:, kt:kt + T] for kt in range(3)],
                              axis=-1)
    wtf = wt.reshape(3 * Cmid, P).astype(cd)
    acc = jnp.einsum("ntpk,ko->ntpo", mid_cat, wtf,
                     preferred_element_type=jnp.float32)

    y = jnp.maximum(acc * bn_p[0] + bn_p[1], 0.0)
    z = jnp.einsum("ntpo,oq->ntpq", y.astype(cd), w2.astype(cd),
                   preferred_element_type=jnp.float32)
    z = z * bn_p[2] + bn_p[3]
    identity = x.astype(jnp.float32).reshape(N, T, HW, C)
    o = jnp.maximum(z + identity, 0.0)

    avg = jnp.mean(o, axis=-1, keepdims=True)
    mx = jnp.max(o, axis=-1, keepdims=True)
    a = jax.nn.sigmoid((avg * ap[0] + mx * ap[1]) * ap[2] + ap[3])
    if attn_last is not None:
        al = jnp.transpose(attn_last, (0, 2, 3, 4, 1)).reshape(N, T, HW, 1)
        a = a * al.astype(jnp.float32)
    out = o * a if if_attn else o

    out_ncdhw = jnp.transpose(out.reshape(N, T, H, W, P), (0, 4, 1, 2, 3))
    attn_ncdhw = jnp.transpose(a.reshape(N, T, H, W, 1), (0, 4, 1, 2, 3))
    return out_ncdhw, attn_ncdhw, True


if __name__ == "__main__":
    key = jax.random.PRNGKey(0)
    k_it = iter(jax.random.split(key, 32))
    nk = lambda: next(k_it)

    # Small shapes consistent with the module (downsample=None -> Cin == planes).
    N, Cin, T, H, W = 2, 4, 4, 8, 8
    planes = Cin
    midplanes = Cin * planes * 3 * 3 * 3 // (Cin * 3 * 3 + 3 * planes)  # = 9

    x = jax.random.normal(nk(), (N, Cin, T, H, W), jnp.float32)
    attn_last = jax.nn.sigmoid(jax.random.normal(nk(), (N, 1, T, H, W),
                                                 jnp.float32))

    def fold_bn(c):
        gamma = 1.0 + 0.1 * jax.random.normal(nk(), (c,), jnp.float32)
        beta = 0.1 * jax.random.normal(nk(), (c,), jnp.float32)
        mean = 0.1 * jax.random.normal(nk(), (c,), jnp.float32)
        var = jnp.abs(jax.random.normal(nk(), (c,), jnp.float32)) + 0.5
        scale = gamma * jax.lax.rsqrt(var + 1e-5)
        bias = beta - mean * scale
        return scale, bias

    w1 = 0.1 * jax.random.normal(nk(), (9, Cin, midplanes), jnp.float32)
    wt = 0.1 * jax.random.normal(nk(), (3, midplanes, planes), jnp.float32)
    w2 = 0.1 * jax.random.normal(nk(), (planes, planes), jnp.float32)
    wa = 0.5 * jax.random.normal(nk(), (2,), jnp.float32)

    s_mid, b_mid = fold_bn(midplanes)
    s1, b1 = fold_bn(planes)
    s2, b2 = fold_bn(planes)
    sa, ba = fold_bn(1)

    params = {
        "w1": w1,
        "wt": wt,
        "w2": w2,
        "bn_mid": jnp.stack([s_mid, b_mid]),                 # (2, Cmid)
        "bn_p": jnp.stack([s1, b1, s2, b2]),                 # (4, P)
        "attnp": jnp.array([wa[0], wa[1], sa[0], ba[0]], jnp.float32),
    }

    rtol = atol = 5e-3  # bf16 matmul operands (reference mirrors the casts)

    # Path 1: attn_last provided, if_attn=True.
    out, attn, flag = ca_block3d_forward(x, attn_last, True, params)
    out = jax.block_until_ready(out)
    attn = jax.block_until_ready(attn)
    ref_out, ref_attn, _ = reference_forward(x, attn_last, True, params)
    assert flag is True
    assert np.allclose(np.asarray(out), np.asarray(ref_out), rtol=rtol, atol=atol)
    assert np.allclose(np.asarray(attn), np.asarray(ref_attn), rtol=rtol, atol=atol)

    # Path 2: attn_last=None, if_attn=False (first block of a chain).
    out2, attn2, _ = ca_block3d_forward(x, None, False, params)
    out2 = jax.block_until_ready(out2)
    attn2 = jax.block_until_ready(attn2)
    ref_out2, ref_attn2, _ = reference_forward(x, None, False, params)
    assert np.allclose(np.asarray(out2), np.asarray(ref_out2), rtol=rtol, atol=atol)
    assert np.allclose(np.asarray(attn2), np.asarray(ref_attn2), rtol=rtol, atol=atol)

    print("KERNEL_OK")
</pallas_src>

<mosaic_0001>
module attributes {stable_mosaic.version = 11 : i64} {
  func.func @kernel(%arg0: i32, %arg1: i32, %arg2: memref<1x1x10x10x4xbf16, #tpu.memory_space<vmem>>, %arg3: memref<1x1x10x10x4xbf16, #tpu.memory_space<vmem>>, %arg4: memref<1x1x1x64xf32, #tpu.memory_space<vmem>>, %arg5: memref<36x9xbf16, #tpu.memory_space<vmem>>, %arg6: memref<3x9x4xbf16, #tpu.memory_space<vmem>>, %arg7: memref<4x4xbf16, #tpu.memory_space<vmem>>, %arg8: memref<2x9xf32, #tpu.memory_space<vmem>>, %arg9: memref<4x4xf32, #tpu.memory_space<vmem>>, %arg10: memref<4xf32, #tpu.memory_space<smem>>, %arg11: memref<1x1x64x4xf32, #tpu.memory_space<vmem>>, %arg12: memref<1x1x1x64xf32, #tpu.memory_space<vmem>>, %arg13: memref<3x64x9xbf16, #tpu.memory_space<vmem>>, %arg14: memref<2x64x4xbf16, #tpu.memory_space<vmem>>, %arg15: memref<64x4xf32, #tpu.memory_space<vmem>>) attributes {dimension_semantics = [#tpu.dimension_semantics<parallel>, #tpu.dimension_semantics<arbitrary>], iteration_bounds = array<i64: 2, 4>, scalar_prefetch = 0 : i64, scratch_operands = 3 : i64, tpu.core_type = #tpu.core_type<tc>, window_params = [{transform_indices = @transform_0, window_bounds = array<i64: 1, 1, 10, 10, 4>}, {transform_indices = @transform_1, window_bounds = array<i64: 1, 1, 10, 10, 4>}, {transform_indices = @transform_2, window_bounds = array<i64: 1, 1, 1, 64>}, {pipeline_mode = #tpu.pipeline_mode<synchronous>, transform_indices = @transform_3, window_bounds = array<i64: 36, 9>}, {pipeline_mode = #tpu.pipeline_mode<synchronous>, transform_indices = @transform_4, window_bounds = array<i64: 3, 9, 4>}, {pipeline_mode = #tpu.pipeline_mode<synchronous>, transform_indices = @transform_5, window_bounds = array<i64: 4, 4>}, {pipeline_mode = #tpu.pipeline_mode<synchronous>, transform_indices = @transform_6, window_bounds = array<i64: 2, 9>}, {pipeline_mode = #tpu.pipeline_mode<synchronous>, transform_indices = @transform_7, window_bounds = array<i64: 4, 4>}, {transform_indices = @transform_8, window_bounds = array<i64: 4>}, {transform_indices = @transform_9, window_bounds = array<i64: 1, 1, 64, 4>}, {transform_indices = @transform_10, window_bounds = array<i64: 1, 1, 1, 64>}]} {
    %c0 = arith.constant 0 : index
    %c0_0 = arith.constant 0 : index
    %0 = vector.load %arg8[%c0, %c0_0] : memref<2x9xf32, #tpu.memory_space<vmem>>, vector<1x9xf32>
    %c1 = arith.constant 1 : index
    %c0_1 = arith.constant 0 : index
    %1 = vector.load %arg8[%c1, %c0_1] : memref<2x9xf32, #tpu.memory_space<vmem>>, vector<1x9xf32>
    %c0_i32 = arith.constant 0 : i32
    %2 = arith.cmpi eq, %arg1, %c0_i32 : i32
    %3 = arith.extui %2 : i1 to i32
    %c0_i32_2 = arith.constant 0 : i32
    %4 = arith.cmpi ne, %3, %c0_i32_2 : i32
    scf.if %4 {
      %c0_51 = arith.constant 0 : index
      %c0_52 = arith.constant 0 : index
      %c0_53 = arith.constant 0 : index
      %c0_54 = arith.constant 0 : index
      %c0_55 = arith.constant 0 : index
      %85 = vector.load %arg2[%c0_51, %c0_52, %c0_53, %c0_54, %c0_55] : memref<1x1x10x10x4xbf16, #tpu.memory_space<vmem>>, vector<1x1x10x10x4xbf16>
      %86 = vector.shape_cast %85 : vector<1x1x10x10x4xbf16> to vector<10x10x4xbf16>
      %87 = vector.extract_strided_slice %86 {offsets = [1, 1, 0], sizes = [8, 8, 4], strides = [1, 1, 1]} : vector<10x10x4xbf16> to vector<8x8x4xbf16>
      %88 = vector.shape_cast %87 : vector<8x8x4xbf16> to vector<64x4xbf16>
      %c0_56 = arith.constant 0 : index
      %c0_57 = arith.constant 0 : index
      %c0_58 = arith.constant 0 : index
      %89 = vector.load %arg14[%c0_56, %c0_57, %c0_58] : memref<2x64x4xbf16, #tpu.memory_space<vmem>>, vector<1x64x4xbf16>
      %90 = vector.shape_cast %89 : vector<1x64x4xbf16> to vector<64x4xbf16>
      %91 = vector.shape_cast %88 : vector<64x4xbf16> to vector<1x64x4xbf16>
      tpu.vector_store %arg14[%c0_56, %c0_57, %c0_58], %91 {strides = array<i32>} : memref<2x64x4xbf16, #tpu.memory_space<vmem>>, vector<1x64x4xbf16>,
      %92 = vector.extract_strided_slice %86 {offsets = [0, 0, 0], sizes = [8, 8, 4], strides = [1, 1, 1]} : vector<10x10x4xbf16> to vector<8x8x4xbf16>
      %93 = vector.shape_cast %92 : vector<8x8x4xbf16> to vector<64x4xbf16>
      %94 = vector.extract_strided_slice %86 {offsets = [0, 1, 0], sizes = [8, 8, 4], strides = [1, 1, 1]} : vector<10x10x4xbf16> to vector<8x8x4xbf16>
      %95 = vector.shape_cast %94 : vector<8x8x4xbf16> to vector<64x4xbf16>
      %96 = vector.extract_strided_slice %86 {offsets = [0, 2, 0], sizes = [8, 8, 4], strides = [1, 1, 1]} : vector<10x10x4xbf16> to vector<8x8x4xbf16>
      %97 = vector.shape_cast %96 : vector<8x8x4xbf16> to vector<64x4xbf16>
      %98 = vector.extract_strided_slice %86 {offsets = [1, 0, 0], sizes = [8, 8, 4], strides = [1, 1, 1]} : vector<10x10x4xbf16> to vector<8x8x4xbf16>
      %99 = vector.shape_cast %98 : vector<8x8x4xbf16> to vector<64x4xbf16>
      %100 = vector.extract_strided_slice %86 {offsets = [1, 1, 0], sizes = [8, 8, 4], strides = [1, 1, 1]} : vector<10x10x4xbf16> to vector<8x8x4xbf16>
      %101 = vector.shape_cast %100 : vector<8x8x4xbf16> to vector<64x4xbf16>
      %102 = vector.extract_strided_slice %86 {offsets = [1, 2, 0], sizes = [8, 8, 4], strides = [1, 1, 1]} : vector<10x10x4xbf16> to vector<8x8x4xbf16>
      %103 = vector.shape_cast %102 : vector<8x8x4xbf16> to vector<64x4xbf16>
      %104 = vector.extract_strided_slice %86 {offsets = [2, 0, 0], sizes = [8, 8, 4], strides = [1, 1, 1]} : vector<10x10x4xbf16> to vector<8x8x4xbf16>
      %105 = vector.shape_cast %104 : vector<8x8x4xbf16> to vector<64x4xbf16>
      %106 = vector.extract_strided_slice %86 {offsets = [2, 1, 0], sizes = [8, 8, 4], strides = [1, 1, 1]} : vector<10x10x4xbf16> to vector<8x8x4xbf16>
      %107 = vector.shape_cast %106 : vector<8x8x4xbf16> to vector<64x4xbf16>
      %108 = vector.extract_strided_slice %86 {offsets = [2, 2, 0], sizes = [8, 8, 4], strides = [1, 1, 1]} : vector<10x10x4xbf16> to vector<8x8x4xbf16>
      %109 = vector.shape_cast %108 : vector<8x8x4xbf16> to vector<64x4xbf16>
      %110 = tpu.concatenate %93, %95, %97, %99, %101, %103, %105, %107, %109 in 1 : vector<64x4xbf16>, vector<64x4xbf16>, vector<64x4xbf16>, vector<64x4xbf16>, vector<64x4xbf16>, vector<64x4xbf16>, vector<64x4xbf16>, vector<64x4xbf16>, vector<64x4xbf16> -> vector<64x36xbf16>
      %c0_59 = arith.constant 0 : index
      %c0_60 = arith.constant 0 : index
      %111 = vector.load %arg5[%c0_59, %c0_60] : memref<36x9xbf16, #tpu.memory_space<vmem>>, vector<36x9xbf16>
      %cst_61 = arith.constant dense<0.000000e+00> : vector<64x9xf32>
      %112 = tpu.matmul %110, %111, %cst_61 {dimension_numbers = #tpu.dot_dimension_numbers<[1], [0], [0], [1], [0, 0, 1, 1], [], []>} : vector<64x36xbf16>, vector<36x9xbf16>, vector<64x9xf32> -> vector<64x9xf32>
      %113 = vector.broadcast %0 : vector<1x9xf32> to vector<64x9xf32>
      %114 = arith.mulf %112, %113 : vector<64x9xf32>
      %115 = vector.broadcast %1 : vector<1x9xf32> to vector<64x9xf32>
      %116 = arith.addf %114, %115 : vector<64x9xf32>
      %cst_62 = arith.constant 0.000000e+00 : f32
      %117 = vector.broadcast %cst_62 : f32 to vector<64x9xf32>
      %118 = arith.maximumf %116, %117 : vector<64x9xf32>
      %119 = arith.truncf %118 : vector<64x9xf32> to vector<64x9xbf16>
      %c0_63 = arith.constant 0 : index
      %c0_64 = arith.constant 0 : index
      %c0_65 = arith.constant 0 : index
      %120 = vector.load %arg13[%c0_63, %c0_64, %c0_65] : memref<3x64x9xbf16, #tpu.memory_space<vmem>>, vector<1x64x9xbf16>
      %121 = vector.shape_cast %120 : vector<1x64x9xbf16> to vector<64x9xbf16>
      %122 = vector.shape_cast %119 : vector<64x9xbf16> to vector<1x64x9xbf16>
      tpu.vector_store %arg13[%c0_63, %c0_64, %c0_65], %122 {strides = array<i32>} : memref<3x64x9xbf16, #tpu.memory_space<vmem>>, vector<1x64x9xbf16>,
    } else {
    }
    %c3_i32 = arith.constant 3 : i32
    %5 = arith.cmpi slt, %arg1, %c3_i32 : i32
    %6 = arith.extui %5 : i1 to i32
    %c0_i32_3 = arith.constant 0 : i32
    %7 = arith.cmpi ne, %6, %c0_i32_3 : i32
    scf.if %7 {
      %c0_51 = arith.constant 0 : index
      %c0_52 = arith.constant 0 : index
      %c0_53 = arith.constant 0 : index
      %c0_54 = arith.constant 0 : index
      %c0_55 = arith.constant 0 : index
      %85 = vector.load %arg3[%c0_51, %c0_52, %c0_53, %c0_54, %c0_55] : memref<1x1x10x10x4xbf16, #tpu.memory_space<vmem>>, vector<1x1x10x10x4xbf16>
      %86 = vector.shape_cast %85 : vector<1x1x10x10x4xbf16> to vector<10x10x4xbf16>
      %87 = vector.extract_strided_slice %86 {offsets = [1, 1, 0], sizes = [8, 8, 4], strides = [1, 1, 1]} : vector<10x10x4xbf16> to vector<8x8x4xbf16>
      %88 = vector.shape_cast %87 : vector<8x8x4xbf16> to vector<64x4xbf16>
      %c1_i32 = arith.constant 1 : i32
      %89 = arith.addi %arg1, %c1_i32 : i32
      %c2_i32_56 = arith.constant 2 : i32
      %90 = arith.remsi %89, %c2_i32_56 : i32
      %91 = arith.index_cast %90 : i32 to index
      %c0_57 = arith.constant 0 : index
      %c0_58 = arith.constant 0 : index
      %92 = vector.load %arg14[%91, %c0_57, %c0_58] : memref<2x64x4xbf16, #tpu.memory_space<vmem>>, vector<1x64x4xbf16>
      %93 = vector.shape_cast %92 : vector<1x64x4xbf16> to vector<64x4xbf16>
      %94 = vector.shape_cast %88 : vector<64x4xbf16> to vector<1x64x4xbf16>
      tpu.vector_store %arg14[%91, %c0_57, %c0_58], %94 {strides = array<i32>} : memref<2x64x4xbf16, #tpu.memory_space<vmem>>, vector<1x64x4xbf16>,
      %95 = vector.extract_strided_slice %86 {offsets = [0, 0, 0], sizes = [8, 8, 4], strides = [1, 1, 1]} : vector<10x10x4xbf16> to vector<8x8x4xbf16>
      %96 = vector.shape_cast %95 : vector<8x8x4xbf16> to vector<64x4xbf16>
      %97 = vector.extract_strided_slice %86 {offsets = [0, 1, 0], sizes = [8, 8, 4], strides = [1, 1, 1]} : vector<10x10x4xbf16> to vector<8x8x4xbf16>
      %98 = vector.shape_cast %97 : vector<8x8x4xbf16> to vector<64x4xbf16>
      %99 = vector.extract_strided_slice %86 {offsets = [0, 2, 0], sizes = [8, 8, 4], strides = [1, 1, 1]} : vector<10x10x4xbf16> to vector<8x8x4xbf16>
      %100 = vector.shape_cast %99 : vector<8x8x4xbf16> to vector<64x4xbf16>
      %101 = vector.extract_strided_slice %86 {offsets = [1, 0, 0], sizes = [8, 8, 4], strides = [1, 1, 1]} : vector<10x10x4xbf16> to vector<8x8x4xbf16>
      %102 = vector.shape_cast %101 : vector<8x8x4xbf16> to vector<64x4xbf16>
      %103 = vector.extract_strided_slice %86 {offsets = [1, 1, 0], sizes = [8, 8, 4], strides = [1, 1, 1]} : vector<10x10x4xbf16> to vector<8x8x4xbf16>
      %104 = vector.shape_cast %103 : vector<8x8x4xbf16> to vector<64x4xbf16>
      %105 = vector.extract_strided_slice %86 {offsets = [1, 2, 0], sizes = [8, 8, 4], strides = [1, 1, 1]} : vector<10x10x4xbf16> to vector<8x8x4xbf16>
      %106 = vector.shape_cast %105 : vector<8x8x4xbf16> to vector<64x4xbf16>
      %107 = vector.extract_strided_slice %86 {offsets = [2, 0, 0], sizes = [8, 8, 4], strides = [1, 1, 1]} : vector<10x10x4xbf16> to vector<8x8x4xbf16>
      %108 = vector.shape_cast %107 : vector<8x8x4xbf16> to vector<64x4xbf16>
      %109 = vector.extract_strided_slice %86 {offsets = [2, 1, 0], sizes = [8, 8, 4], strides = [1, 1, 1]} : vector<10x10x4xbf16> to vector<8x8x4xbf16>
      %110 = vector.shape_cast %109 : vector<8x8x4xbf16> to vector<64x4xbf16>
      %111 = vector.extract_strided_slice %86 {offsets = [2, 2, 0], sizes = [8, 8, 4], strides = [1, 1, 1]} : vector<10x10x4xbf16> to vector<8x8x4xbf16>
      %112 = vector.shape_cast %111 : vector<8x8x4xbf16> to vector<64x4xbf16>
      %113 = tpu.concatenate %96, %98, %100, %102, %104, %106, %108, %110, %112 in 1 : vector<64x4xbf16>, vector<64x4xbf16>, vector<64x4xbf16>, vector<64x4xbf16>, vector<64x4xbf16>, vector<64x4xbf16>, vector<64x4xbf16>, vector<64x4xbf16>, vector<64x4xbf16> -> vector<64x36xbf16>
      %c0_59 = arith.constant 0 : index
      %c0_60 = arith.constant 0 : index
      %114 = vector.load %arg5[%c0_59, %c0_60] : memref<36x9xbf16, #tpu.memory_space<vmem>>, vector<36x9xbf16>
      %cst_61 = arith.constant dense<0.000000e+00> : vector<64x9xf32>
      %115 = tpu.matmul %113, %114, %cst_61 {dimension_numbers = #tpu.dot_dimension_numbers<[1], [0], [0], [1], [0, 0, 1, 1], [], []>} : vector<64x36xbf16>, vector<36x9xbf16>, vector<64x9xf32> -> vector<64x9xf32>
      %116 = vector.broadcast %0 : vector<1x9xf32> to vector<64x9xf32>
      %117 = arith.mulf %115, %116 : vector<64x9xf32>
      %118 = vector.broadcast %1 : vector<1x9xf32> to vector<64x9xf32>
      %119 = arith.addf %117, %118 : vector<64x9xf32>
      %cst_62 = arith.constant 0.000000e+00 : f32
      %120 = vector.broadcast %cst_62 : f32 to vector<64x9xf32>
      %121 = arith.maximumf %119, %120 : vector<64x9xf32>
      %122 = arith.truncf %121 : vector<64x9xf32> to vector<64x9xbf16>
      %c1_i32_63 = arith.constant 1 : i32
      %123 = arith.addi %arg1, %c1_i32_63 : i32
      %c3_i32_64 = arith.constant 3 : i32
      %124 = arith.remsi %123, %c3_i32_64 : i32
      %125 = arith.index_cast %124 : i32 to index
      %c0_65 = arith.constant 0 : index
      %c0_66 = arith.constant 0 : index
      %126 = vector.load %arg13[%125, %c0_65, %c0_66] : memref<3x64x9xbf16, #tpu.memory_space<vmem>>, vector<1x64x9xbf16>
      %127 = vector.shape_cast %126 : vector<1x64x9xbf16> to vector<64x9xbf16>
      %128 = vector.shape_cast %122 : vector<64x9xbf16> to vector<1x64x9xbf16>
      tpu.vector_store %arg13[%125, %c0_65, %c0_66], %128 {strides = array<i32>} : memref<3x64x9xbf16, #tpu.memory_space<vmem>>, vector<1x64x9xbf16>,
    } else {
    }
    %c3_i32_4 = arith.constant 3 : i32
    %8 = arith.remsi %arg1, %c3_i32_4 : i32
    %9 = arith.index_cast %8 : i32 to index
    %c0_5 = arith.constant 0 : index
    %c0_6 = arith.constant 0 : index
    %10 = vector.load %arg13[%9, %c0_5, %c0_6] : memref<3x64x9xbf16, #tpu.memory_space<vmem>>, vector<1x64x9xbf16>
    %11 = vector.shape_cast %10 : vector<1x64x9xbf16> to vector<64x9xbf16>
    %c1_7 = arith.constant 1 : index
    %c0_8 = arith.constant 0 : index
    %c0_9 = arith.constant 0 : index
    %12 = vector.load %arg6[%c1_7, %c0_8, %c0_9] : memref<3x9x4xbf16, #tpu.memory_space<vmem>>, vector<1x9x4xbf16>
    %13 = vector.shape_cast %12 : vector<1x9x4xbf16> to vector<9x4xbf16>
    %cst = arith.constant dense<0.000000e+00> : vector<64x4xf32>
    %14 = tpu.matmul %11, %13, %cst {dimension_numbers = #tpu.dot_dimension_numbers<[1], [0], [0], [1], [0, 0, 1, 1], [], []>} : vector<64x9xbf16>, vector<9x4xbf16>, vector<64x4xf32> -> vector<64x4xf32>
    %c0_10 = arith.constant 0 : index
    %c0_11 = arith.constant 0 : index
    %15 = vector.load %arg15[%c0_10, %c0_11] : memref<64x4xf32, #tpu.memory_space<vmem>>, vector<64x4xf32>
    tpu.vector_store %arg15[%c0_10, %c0_11], %14 {strides = array<i32>} : memref<64x4xf32, #tpu.memory_space<vmem>>, vector<64x4xf32>,
    %c0_i32_12 = arith.constant 0 : i32
    %16 = arith.cmpi sgt, %arg1, %c0_i32_12 : i32
    %17 = arith.extui %16 : i1 to i32
    %c0_i32_13 = arith.constant 0 : i32
    %18 = arith.cmpi ne, %17, %c0_i32_13 : i32
    scf.if %18 {
      %c0_51 = arith.constant 0 : index
      %c0_52 = arith.constant 0 : index
      %85 = vector.load %arg15[%c0_51, %c0_52] : memref<64x4xf32, #tpu.memory_space<vmem>>, vector<64x4xf32>
      %c2_i32_53 = arith.constant 2 : i32
      %86 = arith.addi %arg1, %c2_i32_53 : i32
      %c3_i32_54 = arith.constant 3 : i32
      %87 = arith.remsi %86, %c3_i32_54 : i32
      %88 = arith.index_cast %87 : i32 to index
      %c0_55 = arith.constant 0 : index
      %c0_56 = arith.constant 0 : index
      %89 = vector.load %arg13[%88, %c0_55, %c0_56] : memref<3x64x9xbf16, #tpu.memory_space<vmem>>, vector<1x64x9xbf16>
      %90 = vector.shape_cast %89 : vector<1x64x9xbf16> to vector<64x9xbf16>
      %c0_57 = arith.constant 0 : index
      %c0_58 = arith.constant 0 : index
      %c0_59 = arith.constant 0 : index
      %91 = vector.load %arg6[%c0_57, %c0_58, %c0_59] : memref<3x9x4xbf16, #tpu.memory_space<vmem>>, vector<1x9x4xbf16>
      %92 = vector.shape_cast %91 : vector<1x9x4xbf16> to vector<9x4xbf16>
      %cst_60 = arith.constant dense<0.000000e+00> : vector<64x4xf32>
      %93 = tpu.matmul %90, %92, %cst_60 {dimension_numbers = #tpu.dot_dimension_numbers<[1], [0], [0], [1], [0, 0, 1, 1], [], []>} : vector<64x9xbf16>, vector<9x4xbf16>, vector<64x4xf32> -> vector<64x4xf32>
      %94 = arith.addf %85, %93 : vector<64x4xf32>
      %c0_61 = arith.constant 0 : index
      %c0_62 = arith.constant 0 : index
      %95 = vector.load %arg15[%c0_61, %c0_62] : memref<64x4xf32, #tpu.memory_space<vmem>>, vector<64x4xf32>
      tpu.vector_store %arg15[%c0_61, %c0_62], %94 {strides = array<i32>} : memref<64x4xf32, #tpu.memory_space<vmem>>, vector<64x4xf32>,
    } else {
    }
    %c3_i32_14 = arith.constant 3 : i32
    %19 = arith.cmpi slt, %arg1, %c3_i32_14 : i32
    %20 = arith.extui %19 : i1 to i32
    %c0_i32_15 = arith.constant 0 : i32
    %21 = arith.cmpi ne, %20, %c0_i32_15 : i32
    scf.if %21 {
      %c0_51 = arith.constant 0 : index
      %c0_52 = arith.constant 0 : index
      %85 = vector.load %arg15[%c0_51, %c0_52] : memref<64x4xf32, #tpu.memory_space<vmem>>, vector<64x4xf32>
      %c1_i32 = arith.constant 1 : i32
      %86 = arith.addi %arg1, %c1_i32 : i32
      %c3_i32_53 = arith.constant 3 : i32
      %87 = arith.remsi %86, %c3_i32_53 : i32
      %88 = arith.index_cast %87 : i32 to index
      %c0_54 = arith.constant 0 : index
      %c0_55 = arith.constant 0 : index
      %89 = vector.load %arg13[%88, %c0_54, %c0_55] : memref<3x64x9xbf16, #tpu.memory_space<vmem>>, vector<1x64x9xbf16>
      %90 = vector.shape_cast %89 : vector<1x64x9xbf16> to vector<64x9xbf16>
      %c2_56 = arith.constant 2 : index
      %c0_57 = arith.constant 0 : index
      %c0_58 = arith.constant 0 : index
      %91 = vector.load %arg6[%c2_56, %c0_57, %c0_58] : memref<3x9x4xbf16, #tpu.memory_space<vmem>>, vector<1x9x4xbf16>
      %92 = vector.shape_cast %91 : vector<1x9x4xbf16> to vector<9x4xbf16>
      %cst_59 = arith.constant dense<0.000000e+00> : vector<64x4xf32>
      %93 = tpu.matmul %90, %92, %cst_59 {dimension_numbers = #tpu.dot_dimension_numbers<[1], [0], [0], [1], [0, 0, 1, 1], [], []>} : vector<64x9xbf16>, vector<9x4xbf16>, vector<64x4xf32> -> vector<64x4xf32>
      %94 = arith.addf %85, %93 : vector<64x4xf32>
      %c0_60 = arith.constant 0 : index
      %c0_61 = arith.constant 0 : index
      %95 = vector.load %arg15[%c0_60, %c0_61] : memref<64x4xf32, #tpu.memory_space<vmem>>, vector<64x4xf32>
      tpu.vector_store %arg15[%c0_60, %c0_61], %94 {strides = array<i32>} : memref<64x4xf32, #tpu.memory_space<vmem>>, vector<64x4xf32>,
    } else {
    }
    %c0_16 = arith.constant 0 : index
    %c0_17 = arith.constant 0 : index
    %22 = vector.load %arg15[%c0_16, %c0_17] : memref<64x4xf32, #tpu.memory_space<vmem>>, vector<64x4xf32>
    %c0_18 = arith.constant 0 : index
    %c0_19 = arith.constant 0 : index
    %23 = vector.load %arg9[%c0_18, %c0_19] : memref<4x4xf32, #tpu.memory_space<vmem>>, vector<1x4xf32>
    %24 = vector.broadcast %23 : vector<1x4xf32> to vector<64x4xf32>
    %25 = arith.mulf %22, %24 : vector<64x4xf32>
    %c1_20 = arith.constant 1 : index
    %c0_21 = arith.constant 0 : index
    %26 = vector.load %arg9[%c1_20, %c0_21] : memref<4x4xf32, #tpu.memory_space<vmem>>, vector<1x4xf32>
    %27 = vector.broadcast %26 : vector<1x4xf32> to vector<64x4xf32>
    %28 = arith.addf %25, %27 : vector<64x4xf32>
    %cst_22 = arith.constant 0.000000e+00 : f32
    %29 = vector.broadcast %cst_22 : f32 to vector<64x4xf32>
    %30 = arith.maximumf %28, %29 : vector<64x4xf32>
    %31 = arith.truncf %30 : vector<64x4xf32> to vector<64x4xbf16>
    %c0_23 = arith.constant 0 : index
    %c0_24 = arith.constant 0 : index
    %32 = vector.load %arg7[%c0_23, %c0_24] : memref<4x4xbf16, #tpu.memory_space<vmem>>, vector<4x4xbf16>
    %cst_25 = arith.constant dense<0.000000e+00> : vector<64x4xf32>
    %33 = tpu.matmul %31, %32, %cst_25 {dimension_numbers = #tpu.dot_dimension_numbers<[1], [0], [0], [1], [0, 0, 1, 1], [], []>} : vector<64x4xbf16>, vector<4x4xbf16>, vector<64x4xf32> -> vector<64x4xf32>
    %c2 = arith.constant 2 : index
    %c0_26 = arith.constant 0 : index
    %34 = vector.load %arg9[%c2, %c0_26] : memref<4x4xf32, #tpu.memory_space<vmem>>, vector<1x4xf32>
    %35 = vector.broadcast %34 : vector<1x4xf32> to vector<64x4xf32>
    %36 = arith.mulf %33, %35 : vector<64x4xf32>
    %c3 = arith.constant 3 : index
    %c0_27 = arith.constant 0 : index
    %37 = vector.load %arg9[%c3, %c0_27] : memref<4x4xf32, #tpu.memory_space<vmem>>, vector<1x4xf32>
    %38 = vector.broadcast %37 : vector<1x4xf32> to vector<64x4xf32>
    %39 = arith.addf %36, %38 : vector<64x4xf32>
    %c2_i32 = arith.constant 2 : i32
    %40 = arith.remsi %arg1, %c2_i32 : i32
    %41 = arith.index_cast %40 : i32 to index
    %c0_28 = arith.constant 0 : index
    %c0_29 = arith.constant 0 : index
    %42 = vector.load %arg14[%41, %c0_28, %c0_29] : memref<2x64x4xbf16, #tpu.memory_space<vmem>>, vector<1x64x4xbf16>
    %43 = vector.shape_cast %42 : vector<1x64x4xbf16> to vector<64x4xbf16>
    %44 = arith.extf %43 : vector<64x4xbf16> to vector<64x4xf32>
    %45 = arith.addf %39, %44 : vector<64x4xf32>
    %cst_30 = arith.constant 0.000000e+00 : f32
    %46 = vector.broadcast %cst_30 : f32 to vector<64x4xf32>
    %47 = arith.maximumf %45, %46 : vector<64x4xf32>
    %cst_31 = arith.constant dense<0.000000e+00> : vector<64xf32>
    %48 = vector.multi_reduction <add>, %47, %cst_31 [1] : vector<64x4xf32> to vector<64xf32>
    %49 = vector.shape_cast %48 : vector<64xf32> to vector<64x1xf32>
    %cst_32 = arith.constant 4.000000e+00 : f32
    %50 = vector.broadcast %cst_32 : f32 to vector<64x1xf32>
    %51 = arith.divf %49, %50 : vector<64x1xf32>
    %cst_33 = arith.constant dense<0xFF800000> : vector<64xf32>
    %52 = vector.multi_reduction <maximumf>, %47, %cst_33 [1] : vector<64x4xf32> to vector<64xf32>
    %53 = vector.shape_cast %52 : vector<64xf32> to vector<64x1xf32>
    %c0_34 = arith.constant 0 : index
    %54 = memref.load %arg10[%c0_34] : memref<4xf32, #tpu.memory_space<smem>>
    %55 = vector.broadcast %54 : f32 to vector<64x1xf32>
    %56 = arith.mulf %51, %55 : vector<64x1xf32>
    %c1_35 = arith.constant 1 : index
    %57 = memref.load %arg10[%c1_35] : memref<4xf32, #tpu.memory_space<smem>>
    %58 = vector.broadcast %57 : f32 to vector<64x1xf32>
    %59 = arith.mulf %53, %58 : vector<64x1xf32>
    %60 = arith.addf %56, %59 : vector<64x1xf32>
    %c2_36 = arith.constant 2 : index
    %61 = memref.load %arg10[%c2_36] : memref<4xf32, #tpu.memory_space<smem>>
    %62 = vector.broadcast %61 : f32 to vector<64x1xf32>
    %63 = arith.mulf %60, %62 : vector<64x1xf32>
    %c3_37 = arith.constant 3 : index
    %64 = memref.load %arg10[%c3_37] : memref<4xf32, #tpu.memory_space<smem>>
    %65 = vector.broadcast %64 : f32 to vector<64x1xf32>
    %66 = arith.addf %63, %65 : vector<64x1xf32>
    %67 = arith.negf %66 : vector<64x1xf32>
    %68 = math.exp %67 : vector<64x1xf32>
    %cst_38 = arith.constant 1.000000e+00 : f32
    %69 = vector.broadcast %cst_38 : f32 to vector<64x1xf32>
    %70 = arith.addf %69, %68 : vector<64x1xf32>
    %71 = arith.divf %69, %70 : vector<64x1xf32>
    %c0_39 = arith.constant 0 : index
    %c0_40 = arith.constant 0 : index
    %c0_41 = arith.constant 0 : index
    %c0_42 = arith.constant 0 : index
    %72 = vector.load %arg4[%c0_39, %c0_40, %c0_41, %c0_42] : memref<1x1x1x64xf32, #tpu.memory_space<vmem>>, vector<1x1x1x64xf32>
    %73 = vector.shape_cast %72 : vector<1x1x1x64xf32> to vector<1x64xf32>
    %74 = vector.shape_cast %73 : vector<1x64xf32> to vector<64x1xf32>
    %75 = arith.mulf %71, %74 : vector<64x1xf32>
    %76 = vector.shape_cast %75 : vector<64x1xf32> to vector<1x64xf32>
    %c0_43 = arith.constant 0 : index
    %c0_44 = arith.constant 0 : index
    %c0_45 = arith.constant 0 : index
    %c0_46 = arith.constant 0 : index
    %77 = vector.load %arg12[%c0_43, %c0_44, %c0_45, %c0_46] : memref<1x1x1x64xf32, #tpu.memory_space<vmem>>, vector<1x1x1x64xf32>
    %78 = vector.shape_cast %77 : vector<1x1x1x64xf32> to vector<1x64xf32>
    %79 = vector.shape_cast %76 : vector<1x64xf32> to vector<1x1x1x64xf32>
    tpu.vector_store %arg12[%c0_43, %c0_44, %c0_45, %c0_46], %79 {strides = array<i32>} : memref<1x1x1x64xf32, #tpu.memory_space<vmem>>, vector<1x1x1x64xf32>,
    %80 = vector.broadcast %75 : vector<64x1xf32> to vector<64x4xf32>
    %81 = arith.mulf %47, %80 : vector<64x4xf32>
    %c0_47 = arith.constant 0 : index
    %c0_48 = arith.constant 0 : index
    %c0_49 = arith.constant 0 : index
    %c0_50 = arith.constant 0 : index
    %82 = vector.load %arg11[%c0_47, %c0_48, %c0_49, %c0_50] : memref<1x1x64x4xf32, #tpu.memory_space<vmem>>, vector<1x1x64x4xf32>
    %83 = vector.shape_cast %82 : vector<1x1x64x4xf32> to vector<64x4xf32>
    %84 = vector.shape_cast %81 : vector<64x4xf32> to vector<1x1x64x4xf32>
    tpu.vector_store %arg11[%c0_47, %c0_48, %c0_49, %c0_50], %84 {strides = array<i32>} : memref<1x1x64x4xf32, #tpu.memory_space<vmem>>, vector<1x1x64x4xf32>,
    return
  }
  func.func @transform_0(%arg0: i32, %arg1: i32) -> (i32, i32, i32, i32, i32) {
    %c0_i32 = arith.constant 0 : i32
    %c0_i32_0 = arith.constant 0 : i32
    %c0_i32_1 = arith.constant 0 : i32
    %c0_i32_2 = arith.constant 0 : i32
    %c0_i32_3 = arith.constant 0 : i32
    return %arg0, %c0_i32, %c0_i32_0, %c0_i32_1, %c0_i32_2 : i32, i32, i32, i32, i32
  }
  func.func @transform_1(%arg0: i32, %arg1: i32) -> (i32, i32, i32, i32, i32) {
    %c1_i32 = arith.constant 1 : i32
    %0 = arith.addi %arg1, %c1_i32 : i32
    %c3_i32 = arith.constant 3 : i32
    %1 = arith.minsi %0, %c3_i32 : i32
    %c0_i32 = arith.constant 0 : i32
    %c0_i32_0 = arith.constant 0 : i32
    %c0_i32_1 = arith.constant 0 : i32
    %c0_i32_2 = arith.constant 0 : i32
    return %arg0, %1, %c0_i32, %c0_i32_0, %c0_i32_1 : i32, i32, i32, i32, i32
  }
  func.func @transform_2(%arg0: i32, %arg1: i32) -> (i32, i32, i32, i32) {
    %c0_i32 = arith.constant 0 : i32
    %c0_i32_0 = arith.constant 0 : i32
    %c0_i32_1 = arith.constant 0 : i32
    return %arg0, %arg1, %c0_i32, %c0_i32_0 : i32, i32, i32, i32
  }
  func.func @transform_3(%arg0: i32, %arg1: i32) -> (i32, i32) {
    %c0_i32 = arith.constant 0 : i32
    %c0_i32_0 = arith.constant 0 : i32
    %c0_i32_1 = arith.constant 0 : i32
    return %c0_i32, %c0_i32_0 : i32, i32
  }
  func.func @transform_4(%arg0: i32, %arg1: i32) -> (i32, i32, i32) {
    %c0_i32 = arith.constant 0 : i32
    %c0_i32_0 = arith.constant 0 : i32
    %c0_i32_1 = arith.constant 0 : i32
    %c0_i32_2 = arith.constant 0 : i32
    return %c0_i32, %c0_i32_0, %c0_i32_1 : i32, i32, i32
  }
  func.func @transform_5(%arg0: i32, %arg1: i32) -> (i32, i32) {
    %c0_i32 = arith.constant 0 : i32
    %c0_i32_0 = arith.constant 0 : i32
    %c0_i32_1 = arith.constant 0 : i32
    return %c0_i32, %c0_i32_0 : i32, i32
  }
  func.func @transform_6(%arg0: i32, %arg1: i32) -> (i32, i32) {
    %c0_i32 = arith.constant 0 : i32
    %c0_i32_0 = arith.constant 0 : i32
    %c0_i32_1 = arith.constant 0 : i32
    return %c0_i32, %c0_i32_0 : i32, i32
  }
  func.func @transform_7(%arg0: i32, %arg1: i32) -> (i32, i32) {
    %c0_i32 = arith.constant 0 : i32
    %c0_i32_0 = arith.constant 0 : i32
    %c0_i32_1 = arith.constant 0 : i32
    return %c0_i32, %c0_i32_0 : i32, i32
  }
  func.func @transform_8(%arg0: i32, %arg1: i32) -> i32 {
    %c0_i32 = arith.constant 0 : i32
    %c0_i32_0 = arith.constant 0 : i32
    return %c0_i32 : i32
  }
  func.func @transform_9(%arg0: i32, %arg1: i32) -> (i32, i32, i32, i32) {
    %c0_i32 = arith.constant 0 : i32
    %c0_i32_0 = arith.constant 0 : i32
    %c0_i32_1 = arith.constant 0 : i32
    return %arg0, %arg1, %c0_i32, %c0_i32_0 : i32, i32, i32, i32
  }
  func.func @transform_10(%arg0: i32, %arg1: i32) -> (i32, i32, i32, i32) {
    %c0_i32 = arith.constant 0 : i32
    %c0_i32_0 = arith.constant 0 : i32
    %c0_i32_1 = arith.constant 0 : i32
    return %arg0, %arg1, %c0_i32, %c0_i32_0 : i32, i32, i32, i32
  }
}

</mosaic_0001>

<bundles_post_ra>
// kernel: tpu_custom_call.1
= control target key start
LH: loop header
LB: loop body
LE: loop exit
PB: predicated region body
PF: predicated region fallthrough
CT: control target
= control target key end

     0   :  { %s4364_s0 = inlined_call_operand.vmem [shape: bf16[2,4,10,10,4], index: 0, kind: input, shape index: {}]   ;;  %s4365_s1 = inlined_call_operand.vmem [shape: bf16[2,4,10,10,4], index: 1, kind: input, shape index: {}]   ;;  %s4366_s2 = inlined_call_operand.vmem [shape: f32[2,4,1,64], index: 2, kind: input, shape index: {}]   ;;  %s4367_s3 = inlined_call_operand.vmem [shape: bf16[36,9], index: 3, kind: input, shape index: {}]   ;;  %s4368_s4 = inlined_call_operand.vmem [shape: bf16[3,9,4], index: 4, kind: input, shape index: {}]   ;;  %s4369_s5 = inlined_call_operand.vmem [shape: bf16[4,4], index: 5, kind: input, shape index: {}]   ;;  %s4370_s6 = inlined_call_operand.vmem [shape: f32[2,9], index: 6, kind: input, shape index: {}]   ;;  %s4371_s7 = inlined_call_operand.vmem [shape: f32[4,4], index: 7, kind: input, shape index: {}]   ;;  %s4372_s8 = inlined_call_operand.vmem [shape: f32[4], index: 8, kind: input, shape index: {}]   ;;  %s4373_s9 = inlined_call_operand.vmem [shape: f32[2,4,64,4], index: 9, kind: output, shape index: {0}]   ;;  %s4374_s10 = inlined_call_operand.hbm [shape: f32[2,4,1,64], index: 10, kind: output, shape index: {1}]  }
   0x1   :  { %4388 = sst [smem:[#allocation22_spill]] %s4364_s0 }
   0x2   :  { %4389 = sst [smem:[#allocation23_spill]] %s4370_s6 }
   0x3   :  { %4390 = sst [smem:[#allocation24_spill]] %s4372_s8 }
   0x4   :  { %4391 = sst [smem:[#allocation25_spill]] %s4374_s10 }
   0x5   :  { %16 = vsyncpa [#allocation7], 0 }
   0x6   :  { %17 = vsyncpa [#allocation6], 0 }
   0x7   :  { %19 = vsyncpa [#allocation6 + $0x1], 0  ;;  %s3359_s13 = smov 0   ;;  %s3361_s14 = smov 0  }
   0x8   :  { %s3363_s15 = smov 0   ;;  %s3365_s16 = smov 0  }
   0x9   :  { %s3367_s17 = smov 0   ;;  %s3369_s18 = smov 0  }
   0xa   :  { %s3371_s19 = smov 0   ;;  %s3373_s20 = smov 0  }
   0xb LB: > { %4392 = sst [smem:[#allocation11_spill]] %s3255_s13  ;;  %s2704_s21 = sadd.s32 4294967295, %s3283_s20   ;;  %s3283_s20 = sphi %s3373_s20, %s25_s20   ;;  %s3279_s19 = sphi %s3371_s19, %s4433_s19   ;;  %s3275_s18 = sphi %s3369_s18, %s4432_s18   ;;  %s3271_s17 = sphi %s3367_s17, %s4431_s17   ;;  %s3267_s16 = sphi %s3365_s16, %s4430_s16   ;;  %s3263_s15 = sphi %s3363_s15, %s4429_s15   ;;  %s3259_s14 = sphi %s3361_s14, %s4435_s14   ;;  %s3255_s13 = sphi %s3359_s13, %s4434_s13  }
   0xc   : > { %4393 = sst [smem:[#allocation12_spill]] %s3263_s15  ;;  %s2705_s22 = sadd.s32 4294967294, %s3283_s20  }
   0xd   : > { %4394 = sst [smem:[#allocation13_spill]] %s3271_s17  ;;  %s34_s23 = sadd.s32 1, %s3275_s18 }
   0xe   : > { %4395 = sst [smem:[#allocation14_spill]] %s3275_s18  ;;  %s37_s24 = sadd.s32 1, %s3279_s19 }
   0xf   : > { %4396 = sst [smem:[#allocation15_spill]] %s3279_s19  ;;  %p35_p0 = scmp.ge.s32.totalorder %s34_s23, 4 }
  0x10   : > { %4397 = sst [smem:[#allocation16_spill]] %s3283_s20  ;;  %s288_s25 = sadd.s32 1, %s3263_s15 }
  0x11   : > { %p298_p1 = scmp.ne.s32.totalorder %s3263_s15, %s3259_s14  ;;  %p299_p2 = scmp.eq.s32.totalorder %s2704_s21, 7 }
  0x12   : > { %s4437_s23 = smov (%p35_p0, %s34_s23), 0  ;;  %s4439_s24 = smov (!%p35_p0, %s37_s24), %s3279_s19 }
  0x13   : > { %4398 = sst [smem:[#allocation17_spill]] %s4437_s23  ;;  %s284_s26 = ssub.s32 %s3275_s18, %s4437_s23 }
  0x14   : > { %p3411_p3 = por %p299_p2, %p298_p1  ;;  %p39_p4 = scmp.ge.s32.totalorder %s4439_s24, 2 }
  0x15   : > { %p304_p5 = scmp.ne.s32.totalorder %s3259_s14, %s3255_s13  ;;  %p305_p6 = scmp.eq.s32.totalorder %s2705_s22, 7 }
  0x16   : > { %s4399_s27 = scalar_select %p3411_p3, 1, 0 }
  0x17   : > { %p2706_p7 = scmp.ge.s32.totalorder %s3283_s20, 1  ;;  %s4441_s24 = smov (%p39_p4, %s4439_s24), 0 }
  0x18   : > { %4400 = sst [smem:[#allocation18_spill]] %s4399_s27  ;;  %p3420_p8 = por %p305_p6, %p304_p5 }
  0x19   : > { %4401 = sst [smem:[#allocation19_spill]] %s4441_s24  ;;  %p312_p9 = scmp.lt.s32.totalorder %s3283_s20, 9 }
  0x1a   : > { %s4402_s28 = scalar_select %p3420_p8, 1, 0 }
  0x1b   : > { %s283_s29 = ssub.s32 %s3279_s19, %s4441_s24  ;;  %p3427_p10 = pnand %p2706_p7, %p312_p9 }
  0x1c   : > { %4403 = sst [smem:[#allocation20_spill]] %s4402_s28  ;;  %s285_s30 = sor.u32 %s284_s26, %s283_s29 }
  0x1d   : > { %p286_p11 = scmp.eq.s32.totalorder %s285_s30, 0  ;;  %p3431_p12 = scmp.eq.s32.totalorder %s2704_s21, 0 }
  0x1e   : > { %p3016_p13 = pneg %p3427_p10  ;;  %s4406_s8 = sld [smem:[#allocation24_spill]] }
  0x1f   : > { %s3441_s28 = scalar_select %p286_p11, %s3263_s15, %s288_s25  }
  0x20   : > { %p3017_p0 = pnand %p3431_p12, %p3016_p13 }
  0x21   : > { %4407 = sst [smem:[#allocation21_spill]] %s3441_s28 }
  0x22   : > { %p3172_p2 = pneg %p3017_p0 }
  0x24   : > { %s340_s18 = sshll.u32 %s4406_s8, 4  ;;  %s341_s18 = int_to_ptr.vmem [resolvable:$true] %s340_s18 }
  0x25   : > { %s3170_s26 = scalar_lea.vmem %s341_s18, 16  ;;  %p3178_p6 = scmp.lt.s32.totalorder %s341_s18, %s341_s18 }
  0x26   : > { %p3171_p1 = scmp.ne.s32.totalorder %s341_s18, %s3170_s26  ;;  %p3179_p7 = scmp.lt.s32.totalorder %s3170_s26, %s3170_s26 }
  0x28   : > { %p3173_p4 = pnand %p3172_p2, %p3171_p1  ;;  %p3180_p9 = por %p3179_p7, %p3178_p6 }
  0x2a   : > { %p3174_p5 = pneg %p3173_p4 }
  0x2c   : > { %p3181_p8 = pnand %p3180_p9, %p3174_p5 }
  0x2e   : > { %3184 = shalt.err (!%p3181_p8)
}
  0x2f   : > { %s3285_s21 = smov [#allocation5]   ;;  %389 = sbr.rel (%p3427_p10) target bundleno = 2078 (0x81e), region = 56 }
  0x30   : > { %3019 = dma.vmem_to_smem (!%p3017_p0), %s341_s18, 16, %s3285_s21, [#allocation7]  }
  0x36   : > { %3246 = dma.done.wait (%p3431_p12), [#allocation7], 16  }
  0x37   : > { %3248 = vsyncadd (%p3431_p12), [#allocation7], 4294967280 }
  0x38   : > { %395 = sfence }
  0x39   : > { %p455_p8 = scmp.lt.s32.totalorder %s3271_s17, 1  ;;  %s4408_s6 = sld [smem:[#allocation23_spill]] }
  0x3a   : > { %s3464_s11 = sadd.s32 1, %s3267_s16  ;;  %p477_p11 = scmp.lt.s32.totalorder %s3267_s16, 3 }
  0x3b   : > { %s456_s12 = scalar_select %p455_p8, %s3271_s17, 1 }
  0x3c   : > { %p461_p10 = scmp.lt.s32.totalorder %s3464_s11, 3  ;;  %s4409_s0 = sld [smem:[#allocation22_spill]] }
  0x3d   : > { %s3007_s22 = smul.u32 320, %s456_s12  ;;  %s2716_s26 = sshll.u32 %s456_s12, 2 }
  0x3e   : > { %s462_s21 = scalar_select %p461_p10, %s3464_s11, 3 }
  0x3f   : > { %v3456_v0 = vld [vmem:[%s4408_s6] sm:$0x1]  ;;  %v3461_v1 = vld [vmem:[%s4408_s6 + $0x1] sm:$0x1]  ;;  %s3009_s18 = smul.u32 80, %s456_s12  ;;  %s2718_s6 = sshll.u32 %s456_s12, 5 }
  0x40   : > { %s4443_s21 = smov (!%p461_p10, %s462_s21), 3  ;;  %p2720_p12 = scmp.ne.s32.totalorder %s3267_s16, 0 }
  0x41   : > { %s478_s29 = scalar_select %p477_p11, %s3267_s16, 3 }
  0x42   : > { %s3473_s25 = scalar_lea.vmem %s4409_s0, %s3007_s22  ;;  %s3008_s30 = smul.u32 20, %s4443_s21  ;;  %vm684_vm0 = vcmask (!%p2720_p12), 1042432   ;;  %vm685_vm1 = vcmask (!%p2720_p12), 1046532   ;;  %vm518_vm3 = vsmask.f32 (!%p2720_p12), 3328  ;;  %vm649_vm6 = vcmask (!%p2720_p12), 31744  }
  0x43   : > { %s3476_s24 = sadd.s32 %s2716_s26, %s478_s29  ;;  %s2717_s19 = sshll.u32 %s478_s29, 3  ;;  %v3498_v2 = vld [vmem:[%s3473_s25 + $0x20] sm:$0xf] (!%p2720_p12)  ;;  %v3501_v3 = vld [vmem:[%s3473_s25 + $0x24] sm:$0x1] (!%p2720_p12)  ;;  %vm3519_vm2 = vmor (!%p2720_p12), %vm684_vm0, %vm685_vm1  ;;  %vm958_vm7 = vcmask (!%p2720_p12), 1041408  }
  0x44   : > { %s469_s28 = sadd.s32 %s3009_s18, %s3008_s30  ;;  %s481_s20 = scalar_lea.vmem %s4366_s2, %s3476_s24  ;;  %v3504_v4 = vld [vmem:[%s3473_s25 + $0x28] sm:$0xf] (!%p2720_p12)  ;;  %v3507_v5 = vld [vmem:[%s3473_s25 + $0x2c] sm:$0x1] (!%p2720_p12)  ;;  %v3510_v6 = vld [vmem:[%s3473_s25 + $0x30] sm:$0xf] (!%p2720_p12) }
  0x45   : > { %s2715_s10 = sshll.u32 %s469_s28, 2  ;;  %s488_s27 = sadd.s32 %s2718_s6, %s2717_s19  ;;  %v3513_v7 = vld [vmem:[%s3473_s25 + $0x34] sm:$0x1] (!%p2720_p12)  ;;  %v3517_v8 = vcombine.low (!%p2720_p12), %v3498_v2, %v3504_v4  ;;  %v2729_v10 = vrot.slane (!%p2720_p12), %v3498_v2, 9  ;;  %v705_v11 = vrot.slane (!%p2720_p12), %v3501_v3, 5  ;;  %v2730_v12 = vrot.slane (!%p2720_p12), %v3504_v4, 9 }
  0x46   : > { %s3485_s22 = scalar_lea.vmem %s4365_s1, %s2715_s10  ;;  %s2719_s0 = sshll.u32 %s488_s27, 3  ;;  %v709_v13 = vrot.slane (!%p2720_p12), %v3507_v5, 5  ;;  %v3528_v14 = vld [vmem:[%s3473_s25 + $0x18] sm:$0xf] (!%p2720_p12)  ;;  %v573_v15 = vshll.u32 (!%p2720_p12), %v3501_v3, 16  ;;  %v2731_v16 = vrot.slane (!%p2720_p12), %v3510_v6, 9 }
  0x47   : > { %s3490_s12 = scalar_lea.vmem %s4373_s9, %s2719_s0  ;;  %s4410_s26 = sand.u32 1, %s3259_s14   ;;  %v713_v17 = vrot.slane (!%p2720_p12), %v3513_v7, 5  ;;  %v505_v18 = vld [vmem:[%s3473_s25 + $0x1c] sm:$0x1] (!%p2720_p12)  ;;  %v2728_v19 = vrot.slane (!%p2720_p12), %v3528_v14, 9  ;;  %v3537_v20 = vsel (!%p2720_p12), %vm3519_vm2, %v2729_v10, %v705_v11  ;;  %v550_v28 = vshrl.u32 (!%p2720_p12), %v3528_v14, 16 }
  0x48   : > { %s3494_s29 = scalar_lea.vmem [#allocation8], %s4410_s26  ;;  %497 = sbr.rel (%p2720_p12) target bundleno = 492 (0x1ec), region = 64  ;;  %v3541_v21 = vsel (!%p2720_p12), %vm3519_vm2, %v2730_v12, %v709_v13  ;;  %v701_v22 = vrot.slane (!%p2720_p12), %v505_v18, 5  ;;  %v3544_v23 = vld [vmem:[%s3473_s25] sm:$0xf] (!%p2720_p12)  ;;  %v553_v29 = vshll.u32 (!%p2720_p12), %v3528_v14, 16 }
  0x49   : > { %v3547_v24 = vld [vmem:[%s3473_s25 + $0x4] sm:$0x1] (!%p2720_p12)  ;;  %v3551_v25 = vcombine.low (!%p2720_p12), %v3537_v20, %v3541_v21  ;;  %v3554_v26 = vld [vmem:[%s3473_s25 + $0x8] sm:$0xf] (!%p2720_p12)  ;;  %v501_v27 = vld [vmem:[%s3473_s25 + $0xc] sm:$0x1] (!%p2720_p12)  ;;  %v3561_v30 = vsel (!%p2720_p12), %vm3519_vm2, %v2731_v16, %v713_v17 }
  0x4a   : > { %v3564_v31 = vld [vmem:[%s3473_s25 + $0x10] sm:$0xf] (!%p2720_p12)  ;;  %v503_v32 = vld [vmem:[%s3473_s25 + $0x14] sm:$0x1] (!%p2720_p12)  ;;  %v3568_v33 = vld [vmem:[%s3473_s25 + $0x38] sm:$0xf] (!%p2720_p12)  ;;  %v3574_v34 = vsel (!%p2720_p12), %vm3519_vm2, %v2728_v19, %v701_v22 }
  0x4b   : > { %s3286_s0 = smov (!%p2720_p12), 8   ;;  %v2725_v35 = vrot.slane (!%p2720_p12), %v3544_v23, 9  ;;  %v689_v36 = vrot.slane (!%p2720_p12), %v3547_v24, 5  ;;  %v2726_v37 = vrot.slane (!%p2720_p12), %v3554_v26, 9  ;;  %v3580_v38 = vld [vmem:[%s3473_s25 + $0x3c] sm:$0x1] (!%p2720_p12) }
  0x4c   : > { %786 = vrot.lane.b32.xlu1 (!%p2720_p12), %v3551_v25, %s3286_s0  ;;  %v693_v39 = vrot.slane (!%p2720_p12), %v501_v27, 5  ;;  %v2727_v40 = vrot.slane (!%p2720_p12), %v3564_v31, 9  ;;  %v697_v41 = vrot.slane (!%p2720_p12), %v503_v32, 5  ;;  %v2732_v42 = vrot.slane (!%p2720_p12), %v3568_v33, 9  ;;  %s3287_s6 = smov (!%p2720_p12), 4   ;;  %s3288_s10 = smov (!%p2720_p12), 12  }
  0x4d   : > { %v531_v43 = vshll.u32 (!%p2720_p12), %v501_v27, 16  ;;  %v690_v44 = vsel (!%p2720_p12), %vm3519_vm2, %v2725_v35, %v689_v36  ;;  %v717_v45 = vrot.slane (!%p2720_p12), %v3580_v38, 5  ;;  %v536_v48 = vshrl.u32 (!%p2720_p12), %v3564_v31, 16  ;;  %s3289_s13 = smov (!%p2720_p12), 16   ;;  %s3290_s15 = smov (!%p2720_p12), 20  }
  0x4e   : > { %v3589_v46 = vsel (!%p2720_p12), %vm3519_vm2, %v2726_v37, %v693_v39  ;;  %v3593_v47 = vsel (!%p2720_p12), %vm3519_vm2, %v2727_v40, %v697_v41  ;;  %v539_v49 = vshll.u32 (!%p2720_p12), %v3564_v31, 16  ;;  %vm519_vm4 = vsmask.f32 (!%p2720_p12), 7440  ;;  %s3291_s27 = smov (!%p2720_p12), 24   ;;  %s3292_s8 = smov (!%p2720_p12), 28  }
  0x4f   : > { %v2743_v50 = vcombine.low %v690_v44, %v3589_v46  ;;  %v3600_v51 = vsel %vm3519_vm2, %v2732_v42, %v717_v45  ;;  %v3604_v52 = vcombine.low %v3593_v47, %v3574_v34  ;;  %v538_v54 = vrot.slane %v536_v48, 4  ;;  %vm3618_vm5 = vmor %vm518_vm3, %vm519_vm4  ;;  %s3293_s23 = smov 32  }
  0x50   : > { %v3608_v53 = vcombine.low %v3561_v30, %v3600_v51  ;;  %v541_v55 = vrot.slane %v539_v49, 5  ;;  %v545_v56 = vshll.u32 %v503_v32, 16  ;;  %v552_v57 = vrot.slane %v550_v28, 4 }
  0x51   : > { %782 = vrot.lane.b32.xlu0 %v2743_v50, %s3286_s0  ;;  %v555_v58 = vrot.slane %v553_v29, 5  ;;  %v559_v59 = vshll.u32 %v505_v18, 16  ;;  %v522_v60 = vshrl.u32 %v3554_v26, 16  ;;  %v664_v61 = vshll.u32 %v3547_v24, 16 }
  0x52   : > { %788 = vrot.lane.b32.xlu1 %v3608_v53, %s3286_s0  ;;  %v542_v62 = vor.u32 %v541_v55, %v538_v54  ;;  %v547_v63 = vrot.slane %v545_v56, 5  ;;  %v525_v10 = vshll.u32 %v3554_v26, 16  ;;  %v655_v17 = vshrl.u32 %v3544_v23, 16 }
  0x53   : > { %v556_v12 = vor.u32 %v555_v58, %v552_v57  ;;  %v561_v13 = vrot.slane %v559_v59, 5  ;;  %v524_v16 = vrot.slane %v522_v60, 4  ;;  %v533_v22 = vrot.slane %v531_v43, 5 }
  0x54   : > { %v543_v18 = vrot.slane %v542_v62, 4  ;;  %v527_v19 = vrot.slane %v525_v10, 5  ;;  %v658_v24 = vshll.u32 %v3544_v23, 16  ;;  %v657_v28 = vrot.slane %v655_v17, 4 }
  0x55   : > { %784 = vrot.lane.b32.xlu0 %v3604_v52, %s3286_s0  ;;  %v557_v27 = vrot.slane %v556_v12, 4  ;;  %v592_v29 = vshrl.u32 %v3510_v6, 16  ;;  %v595_v32 = vshll.u32 %v3510_v6, 16  ;;  %v601_v39 = vshll.u32 %v3513_v7, 16 }
  0x56   : > { %v548_v35 = vsel %vm3618_vm5, %v543_v18, %v547_v63  ;;  %v528_v36 = vor.u32 %v527_v19, %v524_v16  ;;  %v660_v37 = vrot.slane %v658_v24, 5  ;;  %v606_v43 = vshrl.u32 %v3568_v33, 16 }
  0x57   : > { %v562_v40 = vsel %vm3618_vm5, %v557_v27, %v561_v13  ;;  %v594_v41 = vrot.slane %v592_v29, 4  ;;  %v597_v42 = vrot.slane %v595_v32, 5  ;;  %v666_v49 = vrot.slane %v664_v61, 5 }
  0x58   : > { %v3634_v44 = vcombine.low %v548_v35, %v562_v40  ;;  %v529_v45 = vrot.slane %v528_v36, 4  ;;  %v661_v48 = vor.u32 %v660_v37, %v657_v28  ;;  %v608_v54 = vrot.slane %v606_v43, 4  ;;  %v515_v28 = vld [vmem:[%s3473_s25 + $0x44] sm:$0x1] }
  0x59   : > { %v598_v50 = vor.u32 %v597_v42, %v594_v41  ;;  %v609_v55 = vshll.u32 %v3568_v33, 16  ;;  %v615_v56 = vshll.u32 %v3580_v38, 16  ;;  %v564_v58 = vshrl.u32 %v3498_v2, 16 }
  0x5a   : > { %764 = vrot.lane.b32.xlu1 %v3634_v44, %s3287_s6  ;;  %v534_v7 = vsel %vm3618_vm5, %v529_v45, %v533_v22  ;;  %v662_v57 = vrot.slane %v661_v48, 4  ;;  %v567_v59 = vshll.u32 %v3498_v2, 16  ;;  %v587_v60 = vshll.u32 %v3507_v5, 16  ;;  %v3650_v22 = vld [vmem:[%s3473_s25 + $0x40] sm:$0xf] }
  0x5b   : > { %v599_v61 = vrot.slane %v598_v50, 4  ;;  %v603_v62 = vrot.slane %v601_v39, 5  ;;  %v611_v63 = vrot.slane %v609_v55, 5  ;;  %v566_v10 = vrot.slane %v564_v58, 4 }
  0x5c   : > { %v667_v38 = vsel %vm3618_vm5, %v662_v57, %v666_v49  ;;  %v569_v12 = vrot.slane %v567_v59, 5  ;;  %v578_v13 = vshrl.u32 %v3504_v4, 16  ;;  %v617_v18 = vrot.slane %v615_v56, 5 }
  0x5d   : > { %v2739_v16 = vcombine.low %v667_v38, %v534_v7  ;;  %v612_v17 = vor.u32 %v611_v63, %v608_v54  ;;  %v581_v19 = vshll.u32 %v3504_v4, 16  ;;  %v575_v5 = vrot.slane %v573_v15, 5 }
  0x5e   : > { %v570_v24 = vor.u32 %v569_v12, %v566_v10  ;;  %v580_v27 = vrot.slane %v578_v13, 4  ;;  %v604_v29 = vsel %vm3618_vm5, %v599_v61, %v603_v62  ;;  %v589_v37 = vrot.slane %v587_v60, 5 }
  0x5f   : > { %762 = vrot.lane.b32.xlu0 %v2739_v16, %s3287_s6  ;;  %v613_v32 = vrot.slane %v612_v17, 4  ;;  %v583_v36 = vrot.slane %v581_v19, 5  ;;  %v2721_v41 = vcombine.low %v534_v7, %v548_v35  ;;  %v620_v42 = vshrl.u32 %v3650_v22, 16  ;;  %v516_v16 = vld [vmem:[%s3473_s25 + $0x48] sm:$0xf] }
  0x60   : > { %v571_v39 = vrot.slane %v570_v24, 4  ;;  %v623_v43 = vshll.u32 %v3650_v22, 16  ;;  %v629_v45 = vshll.u32 %v515_v28, 16  ;;  %v2749_v56 = vcombine.low %v3504_v4, %v3510_v6 }
  0x61   : > { %v618_v3 = vsel %vm3618_vm5, %v613_v32, %v617_v18  ;;  %v584_v15 = vor.u32 %v583_v36, %v580_v27  ;;  %650 = vst.msk [vmem:[#allocation3] sm:$0xff] %vm649_vm6, %v2721_v41  ;;  %v622_v50 = vrot.slane %v620_v42, 4  ;;  %v2750_v4 = vcombine.low %v3568_v33, %v3650_v22 }
  0x62   : > { %v3662_v48 = vcombine.low %v604_v29, %v618_v3  ;;  %v576_v49 = vsel %vm3618_vm5, %v571_v39, %v575_v5  ;;  %v625_v54 = vrot.slane %v623_v43, 5  ;;  %v631_v57 = vrot.slane %v629_v45, 5 }
  0x63   : > { %v585_v35 = vrot.slane %v584_v15, 4  ;;  %v2722_v55 = vcombine.low %v562_v40, %v576_v49  ;;  %v2747_v40 = vcombine.low %v3554_v26, %v3564_v31  ;;  %v2735_v63 = vcombine.low %v3544_v23, %v3554_v26 }
  0x64   : > { %768 = vrot.lane.b32.xlu1 %v3662_v48, %s3287_s6  ;;  %v626_v7 = vor.u32 %v625_v54, %v622_v50  ;;  %v2748_v10 = vcombine.low %v3528_v14, %v3498_v2  ;;  %v2733_v12 = vrot.slane %v3650_v22, 9  ;;  %v723_v13 = vrot.slane %v515_v28, 5 }
  0x65   : > { %v590_v58 = vsel %vm3618_vm5, %v585_v35, %v589_v37  ;;  %651 = vst.msk [vmem:[#allocation3 + $0x8] sm:$0xff] %vm649_vm6, %v2722_v55  ;;  %v2753_v17 = vcombine.low %v3541_v21, %v3561_v30  ;;  %v726_v19 = vshrl.u32 %v516_v16, 16  ;;  %v729_v24 = vshll.u32 %v516_v16, 16 }
  0x66   : > { %v3674_v59 = vcombine.low %v576_v49, %v590_v58  ;;  %v2723_v60 = vcombine.low %v590_v58, %v604_v29  ;;  %v627_v61 = vrot.slane %v626_v7, 4  ;;  %v724_v18 = vsel %vm3519_vm2, %v2733_v12, %v723_v13  ;;  %v517_v29 = vld [vmem:[%s3473_s25 + $0x4c] sm:$0x1] }
  0x67   : > { %v2751_v2 = vcombine.low %v3589_v46, %v3593_v47  ;;  %v2754_v5 = vcombine.low %v3600_v51, %v724_v18  ;;  %v728_v27 = vrot.slane %v726_v19, 4  ;;  %v731_v28 = vrot.slane %v729_v24, 5  ;;  %v3117_v46 = vld [vmem:[%s4367_s3] sm:$0xff]  }
  0x68   : > { %766 = vrot.lane.b32.xlu0 %v3674_v59, %s3287_s6  ;;  %799 = vrot.lane.b32.xlu1 %v2749_v56, %s3288_s10  ;;  %652 = vst.msk [vmem:[#allocation3 + $0x10] sm:$0xff] %vm649_vm6, %v2723_v60  ;;  %v632_v62 = vsel %vm3618_vm5, %v627_v61, %v631_v57  ;;  %v2752_v21 = vcombine.low %v3574_v34, %v3537_v20  ;;  %v735_v36 = vshll.u32 %v517_v29, 16  ;;  %v2734_v37 = vrot.slane %v516_v16, 9 }
  0x69   : > { %v2724_v38 = vcombine.low %v618_v3, %v632_v62  ;;  %v3704_v30 = vcombine.low %v3510_v6, %v3568_v33  ;;  %v732_v32 = vor.u32 %v731_v28, %v728_v27  ;;  %v3712_v47 = vcombine.low %v3564_v31, %v3528_v14  ;;  %2913 = vmatprep.subr.bf16.mxu0 %v3117_v46  ;;  %v3118_v6 = vld [vmem:[%s4367_s3 + $0x8] sm:$0xff]   ;;  %v3119_v14 = vld [vmem:[%s4367_s3 + $0x10] ss:$0 sps:$4 sm:$0x33]  }
  0x6a   : > { %v2755_v20 = vcombine.low %v3650_v22, %v516_v16  ;;  %v737_v51 = vrot.slane %v735_v36, 5  ;;  %2981 = vmatprep.subr.bf16.mxu1 %v3117_v46  ;;  %2914 = vmatpush3.bf16.msra.mxu0 %v3117_v46  ;;  %v960_v22 = vsel %vm958_vm7, %v3119_v14, 0  ;;  %v743_v39 = vrot.slane %v517_v29, 5 }
  0x6b   : > { %653 = vst.msk [vmem:[#allocation3 + $0x18] sm:$0xff] %vm649_vm6, %v2724_v38  ;;  %v733_v34 = vrot.slane %v732_v32, 4  ;;  %2984 = vmatpush3.bf16.msra.mxu1 %v3117_v46  ;;  %2915 = vmatprep.subr.bf16.mxu0 %v3118_v6  ;;  %vm875_vm8 = vcmask 97280   ;;  %vm866_vm9 = vcmask 64512   ;;  %vm884_vm10 = vcmask 130048  }
  0x6c   : > { %795 = vrot.lane.b32.xlu0 %v2747_v40, %s3288_s10  ;;  %801 = vrot.lane.b32.xlu1 %v2750_v4, %s3288_s10  ;;  %v744_v11 = vsel %vm3519_vm2, %v2734_v37, %v743_v39  ;;  %vm893_vm11 = vcmask 162816   ;;  %vm902_vm12 = vcmask 195584   ;;  %vm911_vm13 = vcmask 228352  }
  0x6d   : > { %v738_v33 = vsel %vm3618_vm5, %v733_v34, %v737_v51  ;;  %2982 = vmatprep.subr.bf16.mxu1 %v3118_v6  ;;  %vm920_vm14 = vcmask 261120   ;;  %vm949_vm15 = vcmask 293888   ;;  %vm1063_vm0 = vcmask 72704  }
  0x6e   : > { %2916 = vmatpush3.bf16.msra.mxu0 %v3118_v6  ;;  %v2756_v31 = vcombine.low %v632_v62, %v738_v33 }
  0x6f   : > { %2985 = vmatpush3.bf16.msra.mxu1 %v3118_v6  ;;  %3001 = vmatprep.subr.msk.bf16.mxu0 %vm958_vm7, %v3119_v14 }
  0x70   : > { %797 = vrot.lane.b32.xlu0 %v2748_v10, %s3288_s10  ;;  %807 = vrot.lane.b32.xlu1 %v2723_v60, %s3289_s13 }
  0x71   : > { %3002 = vmatprep.subr.msk.bf16.mxu1 %vm958_vm7, %v3119_v14 }
  0x72   : > { %2918 = vmatpush3.bf16.msra.mxu0 %v960_v22 }
  0x73   : > { %2986 = vmatpush3.bf16.msra.mxu1 %v960_v22 }
  0x74   : > { %803 = vrot.lane.b32.xlu0 %v2721_v41, %s3289_s13  ;;  %809 = vrot.lane.b32.xlu1 %v2724_v38, %s3289_s13  ;;  %v2757_v41 = vcombine.low %v724_v18, %v744_v11 }
  0x78   : > { %805 = vrot.lane.b32.xlu0 %v2722_v55, %s3289_s13  ;;  %820 = vrot.lane.b32.xlu1 %v2753_v17, %s3290_s15 }
  0x7c   : > { %816 = vrot.lane.b32.xlu0 %v2751_v2, %s3290_s15  ;;  %822 = vrot.lane.b32.xlu1 %v2754_v5, %s3290_s15 }
  0x80   : > { %818 = vrot.lane.b32.xlu0 %v2752_v21, %s3290_s15  ;;  %830 = vrot.lane.b32.xlu1 %v3704_v30, %s3291_s27 }
  0x84   : > { %826 = vrot.lane.b32.xlu0 %v3712_v47, %s3291_s27  ;;  %832 = vrot.lane.b32.xlu1 %v2755_v20, %s3291_s27 }
  0x88   : > { %828 = vrot.lane.b32.xlu0 %v3517_v8, %s3291_s27  ;;  %840 = vrot.lane.b32.xlu1 %v3662_v48, %s3292_s8 }
  0x8c   : > { %836 = vrot.lane.b32.xlu0 %v3634_v44, %s3292_s8  ;;  %842 = vrot.lane.b32.xlu1 %v2756_v31, %s3292_s8 }
  0x90   : > { %838 = vrot.lane.b32.xlu0 %v3674_v59, %s3292_s8  ;;  %850 = vrot.lane.b32.xlu1 %v3608_v53, %s3293_s23 }
  0x94   : > { %846 = vrot.lane.b32.xlu0 %v3604_v52, %s3293_s23  ;;  %852 = vrot.lane.b32.xlu1 %v2757_v41, %s3293_s23 }
  0x98   : > { %848 = vrot.lane.b32.xlu0 %v3551_v25, %s3293_s23 }
  0xbe   : > { %v787_v42 = vpop.permute.xlu1 %786 }
  0xc3   : > { %v783_v43 = vpop.permute.xlu0 %782 }
  0xc4   : > { %v789_v3 = vpop.permute.xlu1 %788 }
  0xc7   : > { %v785_v15 = vpop.permute.xlu0 %784 }
  0xcc   : > { %v765_v44 = vpop.permute.xlu1 %764 }
  0xd1   : > { %v763_v45 = vpop.permute.xlu0 %762 }
  0xd2   : > { %v856_v10 = vsel %vm649_vm6, %v2735_v63, %v763_v45  ;;  %v859_v63 = vsel %vm649_vm6, %v3712_v47, %v765_v44 }
  0xd3   : > { %v868_v19 = vsel %vm866_vm9, %v856_v10, %v783_v43  ;;  %v870_v46 = vsel %vm866_vm9, %v859_v63, %v785_v15 }
  0xd6   : > { %v769_v48 = vpop.permute.xlu1 %768 }
  0xd7   : > { %v865_v12 = vsel %vm649_vm6, %v3704_v30, %v769_v48 }
  0xd8   : > { %v874_v23 = vsel %vm866_vm9, %v865_v12, %v789_v3  ;;  %v1027_v3 = vlaneseq }
  0xda   : > { %v767_v9 = vpop.permute.xlu0 %766  ;;  %v800_v49 = vpop.permute.xlu1 %799  ;;  %v1028_v15 = vshrl.u32 %v1027_v3, 7 }
  0xdb   : > { %v862_v40 = vsel %vm649_vm6, %v3517_v8, %v767_v9 }
  0xdc   : > { %v872_v38 = vsel %vm866_vm9, %v862_v40, %v787_v42  ;;  %v1029_v44 = vsub.s32 0, %v1028_v15 }
  0xdd   : > { %v881_v13 = vsel %vm875_vm8, %v872_v38, %v800_v49 }
  0xde   : > { %v796_v50 = vpop.permute.xlu0 %795  ;;  %v802_v54 = vpop.permute.xlu1 %801  ;;  %v1030_v45 = vrot.slane %v3456_v0, %v1029_v44  ;;  %v1042_v48 = vrot.slane %v3461_v1, %v1029_v44 }
  0xdf   : > { %v877_v24 = vsel %vm875_vm8, %v868_v19, %v796_v50  ;;  %v883_v2 = vsel %vm875_vm8, %v874_v23, %v802_v54 }
  0xe2   : > { %v798_v35 = vpop.permute.xlu0 %797  ;;  %v808_v55 = vpop.permute.xlu1 %807 }
  0xe3   : > { %v890_v17 = vsel %vm884_vm10, %v881_v13, %v808_v55  ;;  %v879_v34 = vsel %vm875_vm8, %v870_v46, %v798_v35 }
  0xe6   : > { %v804_v53 = vpop.permute.xlu0 %803  ;;  %v810_v56 = vpop.permute.xlu1 %809 }
  0xe7   : > { %v886_v29 = vsel %vm884_vm10, %v877_v24, %v804_v53  ;;  %v892_v21 = vsel %vm884_vm10, %v883_v2, %v810_v56 }
  0xea   : > { %v806_v7 = vpop.permute.xlu0 %805  ;;  %v821_v52 = vpop.permute.xlu1 %820 }
  0xeb   : > { %v899_v18 = vsel %vm893_vm11, %v890_v17, %v821_v52  ;;  %v888_v31 = vsel %vm884_vm10, %v879_v34, %v806_v7 }
  0xee   : > { %v817_v57 = vpop.permute.xlu0 %816  ;;  %v823_v58 = vpop.permute.xlu1 %822 }
  0xef   : > { %v895_v32 = vsel %vm893_vm11, %v886_v29, %v817_v57  ;;  %v901_v36 = vsel %vm893_vm11, %v892_v21, %v823_v58 }
  0xf2   : > { %v819_v25 = vpop.permute.xlu0 %818  ;;  %v831_v59 = vpop.permute.xlu1 %830 }
  0xf3   : > { %v908_v26 = vsel %vm902_vm12, %v899_v18, %v831_v59  ;;  %v897_v39 = vsel %vm893_vm11, %v888_v31, %v819_v25 }
  0xf6   : > { %v827_v60 = vpop.permute.xlu0 %826  ;;  %v833_v61 = vpop.permute.xlu1 %832 }
  0xf7   : > { %v904_v47 = vsel %vm902_vm12, %v895_v32, %v827_v60  ;;  %v910_v20 = vsel %vm902_vm12, %v901_v36, %v833_v61 }
  0xfa   : > { %v829_v4 = vpop.permute.xlu0 %828  ;;  %v841_v62 = vpop.permute.xlu1 %840 }
  0xfb   : > { %v917_v5 = vsel %vm911_vm13, %v908_v26, %v841_v62  ;;  %v906_v11 = vsel %vm902_vm12, %v897_v39, %v829_v4 }
  0xfe   : > { %v837_v8 = vpop.permute.xlu0 %836  ;;  %v843_v16 = vpop.permute.xlu1 %842 }
  0xff   : > { %v913_v51 = vsel %vm911_vm13, %v904_v47, %v837_v8  ;;  %v919_v6 = vsel %vm911_vm13, %v910_v20, %v843_v16 }
 0x102   : > { %v839_v27 = vpop.permute.xlu0 %838  ;;  %v851_v28 = vpop.permute.xlu1 %850 }
 0x103   : > { %v926_v30 = vsel %vm920_vm14, %v917_v5, %v851_v28  ;;  %v915_v41 = vsel %vm911_vm13, %v906_v11, %v839_v27 }
 0x104   : > { %2923 = vmatprep.mubr.msk.bf16.mxu1 %vm949_vm15, %v926_v30 }
 0x106   : > { %v847_v33 = vpop.permute.xlu0 %846  ;;  %v853_v14 = vpop.permute.xlu1 %852 }
 0x107   : > { %v922_v22 = vsel %vm920_vm14, %v913_v51, %v847_v33  ;;  %v928_v37 = vsel %vm920_vm14, %v919_v6, %v853_v14 }
 0x108   : > { %2919 = vmatprep.mubr.msk.bf16.mxu0 %vm949_vm15, %v922_v22  ;;  %2924 = vmatmul.mubr.msk.bf16.vlgmr.msra.gmra.mrb[0].mxu1 %vm949_vm15, %v928_v37 }
 0x10a   : > { %v849_v42 = vpop.permute.xlu0 %848 }
 0x10b   : > { %v924_v43 = vsel %vm920_vm14, %v915_v41, %v849_v42 }
 0x10c   : > { %2920 = vmatmul.mubr.msk.bf16.vlgmr.msra.gmra.mrb[0].mxu0 %vm949_vm15, %v924_v43 }
 0x1db   : > { %v2925_v9 = vpop.f32.mrb[0].mxu1 }
 0x1dc   : > { %v1037_v49 = vmul.f32 %v2925_v9, %v1030_v45  ;;  %v1012_v50 = vpop.f32.mrb[1].mxu1 }
 0x1dd   : > { %v1035_v54 = vmul.f32 %v1030_v45, %v1012_v50  ;;  %v2926_v35 = vpop.f32.mrb[2].mxu1 }
 0x1de   : > { %v1049_v55 = vadd.f32 %v1042_v48, %v1037_v49  ;;  %v1038_v53 = vmul.f32 %v2926_v35, %v1030_v45  ;;  %v1015_v56 = vpop.f32.mrb[3].mxu1 }
 0x1df   : > { %v2921_v7 = vpop.f32.mrb[0].mxu0  ;;  %v1047_v52 = vadd.f32 %v1042_v48, %v1035_v54  ;;  %v1036_v57 = vmul.f32 %v1030_v45, %v1015_v56 }
 0x1e0   : > { %v1033_v58 = vmul.f32 %v2921_v7, %v1030_v45  ;;  %v996_v25 = vpop.f32.mrb[1].mxu0  ;;  %v1050_v59 = vadd.f32 %v1042_v48, %v1038_v53  ;;  %v1057_v62 = vmax.f32 %v1049_v55, 0.0 }
 0x1e1   : > { %v1031_v60 = vmul.f32 %v1030_v45, %v996_v25  ;;  %v2922_v61 = vpop.f32.mrb[2].mxu0  ;;  %v1048_v40 = vadd.f32 %v1042_v48, %v1036_v57  ;;  %v1055_v8 = vmax.f32 %v1047_v52, 0.0 }
 0x1e2   : > { %v1045_v4 = vadd.f32 %v1042_v48, %v1033_v58  ;;  %v1034_v38 = vmul.f32 %v2922_v61, %v1030_v45  ;;  %v1058_v10 = vmax.f32 %v1050_v59, 0.0  ;;  %v999_v12 = vpop.f32.mrb[3].mxu0 }
 0x1e3   : > { %v1043_v13 = vadd.f32 %v1042_v48, %v1031_v60  ;;  %v1032_v16 = vmul.f32 %v1030_v45, %v999_v12  ;;  %v1056_v17 = vmax.f32 %v1048_v40, 0.0 }
 0x1e4   : > { %v1046_v18 = vadd.f32 %v1042_v48, %v1034_v38  ;;  %v1062_v19 = vpack.c.bf16 %v1058_v10, %v1057_v62  ;;  %v1053_v63 = vmax.f32 %v1045_v4, 0.0 }
 0x1e5   : > { %v1044_v23 = vadd.f32 %v1042_v48, %v1032_v16  ;;  %v1061_v26 = vpack.c.bf16 %v1056_v17, %v1055_v8  ;;  %v1051_v2 = vmax.f32 %v1043_v13, 0.0 }
 0x1e6   : > { %v1054_v24 = vmax.f32 %v1046_v18, 0.0  ;;  %1067 = vst.msk [vmem:[#allocation2 + $0x18] sm:$0xff] %vm1063_vm0, %v1062_v19 }
 0x1e7   : > { %v1052_v5 = vmax.f32 %v1044_v23, 0.0  ;;  %1066 = vst.msk [vmem:[#allocation2 + $0x10] sm:$0xff] %vm1063_vm0, %v1061_v26 }
 0x1e8   : > { %v1060_v27 = vpack.c.bf16 %v1054_v24, %v1053_v63 }
 0x1e9   : > { %v1059_v28 = vpack.c.bf16 %v1052_v5, %v1051_v2 }
 0x1ea   : > { %1065 = vst.msk [vmem:[#allocation2 + $0x8] sm:$0xff] %vm1063_vm0, %v1060_v27 }
 0x1eb   : > { %1064 = vst.msk [vmem:[#allocation2] sm:$0xff] %vm1063_vm0, %v1059_v28 }
 0x1ec PF: > { %p2765_p13 = scmp.ge.s32.totalorder %s3267_s16, 3 }
 0x1ed   : > { %v3785_v29 = vld [vmem:[%s3485_s22 + $0x20] sm:$0xf] (!%p2765_p13)  ;;  %v3788_v21 = vld [vmem:[%s3485_s22 + $0x24] sm:$0x1] (!%p2765_p13)  ;;  %v3791_v30 = vld [vmem:[%s3485_s22 + $0x28] sm:$0xf] (!%p2765_p13) }
 0x1ee   : > { %1071 = sbr.rel (%p2765_p13) target bundleno = 917 (0x395), region = 68  ;;  %v3794_v32 = vld [vmem:[%s3485_s22 + $0x2c] sm:$0x1] (!%p2765_p13)  ;;  %v3797_v36 = vld [vmem:[%s3485_s22 + $0x30] sm:$0xf] (!%p2765_p13)  ;;  %v3804_v47 = vcombine.low (!%p2765_p13), %v3785_v29, %v3791_v30  ;;  %vm1268_vm1 = vcmask (!%p2765_p13), 1042432  }
 0x1ef   : > { %v3800_v46 = vld [vmem:[%s3485_s22 + $0x34] sm:$0x1] (!%p2765_p13)  ;;  %vm1269_vm2 = vcmask (!%p2765_p13), 1046532   ;;  %v2777_v34 = vrot.slane (!%p2765_p13), %v3785_v29, 9  ;;  %v1289_v51 = vrot.slane (!%p2765_p13), %v3788_v21, 5  ;;  %v2778_v6 = vrot.slane (!%p2765_p13), %v3791_v30, 9 }
 0x1f0   : > { %vm3806_vm3 = vmor (!%p2765_p13), %vm1268_vm1, %vm1269_vm2  ;;  %v1293_v33 = vrot.slane (!%p2765_p13), %v3794_v32, 5  ;;  %v3815_v14 = vld [vmem:[%s3485_s22 + $0x18] sm:$0xf] (!%p2765_p13)  ;;  %v1154_v31 = vshll.u32 (!%p2765_p13), %v3788_v21, 16  ;;  %v2779_v22 = vrot.slane (!%p2765_p13), %v3797_v36, 9  ;;  %v1297_v37 = vrot.slane (!%p2765_p13), %v3800_v46, 5 }
 0x1f1   : > { %v1079_v39 = vld [vmem:[%s3485_s22 + $0x1c] sm:$0x1] (!%p2765_p13)  ;;  %v2776_v11 = vrot.slane (!%p2765_p13), %v3815_v14, 9  ;;  %v3824_v41 = vsel (!%p2765_p13), %vm3806_vm3, %v2777_v34, %v1289_v51  ;;  %v3831_v3 = vld [vmem:[%s3485_s22] sm:$0xf] (!%p2765_p13)  ;;  %v1131_v9 = vshrl.u32 (!%p2765_p13), %v3815_v14, 16 }
 0x1f2   : > { %v3828_v42 = vsel (!%p2765_p13), %vm3806_vm3, %v2778_v6, %v1293_v33  ;;  %v1285_v43 = vrot.slane (!%p2765_p13), %v1079_v39, 5  ;;  %v3834_v15 = vld [vmem:[%s3485_s22 + $0x4] sm:$0x1] (!%p2765_p13)  ;;  %v3841_v45 = vld [vmem:[%s3485_s22 + $0x8] sm:$0xf] (!%p2765_p13)  ;;  %v1134_v49 = vshll.u32 (!%p2765_p13), %v3815_v14, 16  ;;  %v3848_v50 = vsel (!%p2765_p13), %vm3806_vm3, %v2779_v22, %v1297_v37 }
 0x1f3   : > { %v3838_v44 = vcombine.low (!%p2765_p13), %v3824_v41, %v3828_v42  ;;  %v1075_v48 = vld [vmem:[%s3485_s22 + $0xc] sm:$0x1] (!%p2765_p13)  ;;  %v3851_v54 = vld [vmem:[%s3485_s22 + $0x10] sm:$0xf] (!%p2765_p13)  ;;  %v1077_v35 = vld [vmem:[%s3485_s22 + $0x14] sm:$0x1] (!%p2765_p13) }
 0x1f4   : > { %v3855_v55 = vld [vmem:[%s3485_s22 + $0x38] sm:$0xf] (!%p2765_p13)  ;;  %s3294_s21 = smov (!%p2765_p13), 8   ;;  %v3861_v53 = vsel (!%p2765_p13), %vm3806_vm3, %v2776_v11, %v1285_v43  ;;  %v2773_v56 = vrot.slane (!%p2765_p13), %v3831_v3, 9  ;;  %v1273_v7 = vrot.slane (!%p2765_p13), %v3834_v15, 5  ;;  %v2774_v52 = vrot.slane (!%p2765_p13), %v3841_v45, 9 }
 0x1f5   : > { %1370 = vrot.lane.b32.xlu1 %v3838_v44, %s3294_s21  ;;  %v3867_v57 = vld [vmem:[%s3485_s22 + $0x3c] sm:$0x1]  ;;  %v1277_v58 = vrot.slane %v1075_v48, 5  ;;  %v2775_v25 = vrot.slane %v3851_v54, 9  ;;  %v1281_v59 = vrot.slane %v1077_v35, 5  ;;  %v2780_v60 = vrot.slane %v3855_v55, 9 }
 0x1f6   : > { %v1112_v61 = vshll.u32 %v1075_v48, 16  ;;  %v1274_v40 = vsel %vm3806_vm3, %v2773_v56, %v1273_v7  ;;  %v1301_v4 = vrot.slane %v3867_v57, 5  ;;  %vm1099_vm4 = vsmask.f32 3328  ;;  %s1094_s26 = ssub.s32 0, %s3464_s11  ;;  %p1093_p0 = scmp.lt.s32.totalorder %s3464_s11, 0 }
 0x1f7   : > { %v3876_v62 = vsel %vm3806_vm3, %v2774_v52, %v1277_v58  ;;  %v3880_v38 = vsel %vm3806_vm3, %v2775_v25, %v1281_v59  ;;  %v1117_v10 = vshrl.u32 %v3851_v54, 16  ;;  %v1120_v12 = vshll.u32 %v3851_v54, 16  ;;  %s3895_s0 = smin.u32 %s1094_s26, %s3464_s11  ;;  %s3295_s13 = smov 4  }
 0x1f8   : > { %v2791_v13 = vcombine.low %v1274_v40, %v3876_v62  ;;  %v3888_v8 = vsel %vm3806_vm3, %v2780_v60, %v1301_v4  ;;  %v3892_v16 = vcombine.low %v3880_v38, %v3861_v53  ;;  %vm1100_vm5 = vsmask.f32 7440  ;;  %3127 = sdivrem.u32 %s3895_s0, 3  ;;  %s1096_s6 = sand.u32 1, %s3895_s0  }
 0x1f9   : > { %v3899_v17 = vcombine.low %v3848_v50, %v3888_v8  ;;  %v1119_v18 = vrot.slane %v1117_v10, 4  ;;  %v1122_v19 = vrot.slane %v1120_v12, 5  ;;  %v1126_v23 = vshll.u32 %v1077_v35, 16  ;;  %vm3911_vm6 = vmor %vm1099_vm4, %vm1100_vm5  ;;  %s1097_s10 = ssub.s32 0, %s1096_s6  ;;  %s3296_s19 = smov 12  }
 0x1fa   : > { %1366 = vrot.lane.b32.xlu0 %v2791_v13, %s3294_s21  ;;  %v1133_v26 = vrot.slane %v1131_v9, 4  ;;  %v1136_v63 = vrot.slane %v1134_v49, 5  ;;  %v1140_v24 = vshll.u32 %v1079_v39, 16  ;;  %v1103_v2 = vshrl.u32 %v3841_v45, 16  ;;  %s4445_s10 = smov (!%p1093_p0, %s1097_s10), %s1096_s6  ;;  %s3297_s27 = smov 16  }
 0x1fb   : > { %v1248_v5 = vshll.u32 %v3834_v15, 16  ;;  %1372 = vrot.lane.b32.xlu1 %v3899_v17, %s3294_s21  ;;  %v1123_v27 = vor.u32 %v1122_v19, %v1119_v18  ;;  %v1128_v28 = vrot.slane %v1126_v23, 5  ;;  %v1106_v34 = vshll.u32 %v3841_v45, 16  ;;  %s2873_s15 = sshll.u32 %s4445_s10, 5  ;;  %s3298_s28 = smov 20  }
 0x1fc   : > { %v1137_v6 = vor.u32 %v1136_v63, %v1133_v26  ;;  %v1142_v33 = vrot.slane %v1140_v24, 5  ;;  %v1105_v22 = vrot.slane %v1103_v2, 4  ;;  %v1239_v37 = vshrl.u32 %v3831_v3, 16  ;;  %s1232_s17 = scalar_lea.vmem [#allocation3], %s2873_s15  ;;  %s3299_s30 = smov 24  }
 0x1fd   : > { %v1124_v39 = vrot.slane %v1123_v27, 4  ;;  %v1108_v11 = vrot.slane %v1106_v34, 5  ;;  %v1114_v43 = vrot.slane %v1112_v61, 5  ;;  %v1242_v15 = vshll.u32 %v3831_v3, 16  ;;  %s3300_s26 = smov 28   ;;  %s3301_s0 = smov 32  }
 0x1fe   : > { %1368 = vrot.lane.b32.xlu0 %v3892_v16, %s3294_s21  ;;  %v1138_v48 = vrot.slane %v1137_v6, 4  ;;  %v1241_v9 = vrot.slane %v1239_v37, 4  ;;  %v1173_v49 = vshrl.u32 %v3797_v36, 16  ;;  %v1176_v35 = vshll.u32 %v3797_v36, 16 }
 0x1ff   : > { %v1129_v56 = vsel %vm3911_vm6, %v1124_v39, %v1128_v28  ;;  %v1109_v7 = vor.u32 %v1108_v11, %v1105_v22  ;;  %v1244_v52 = vrot.slane %v1242_v15, 5  ;;  %v1182_v58 = vshll.u32 %v3800_v46, 16 }
 0x200   : > { %v1143_v25 = vsel %vm3911_vm6, %v1138_v48, %v1142_v33  ;;  %v1175_v59 = vrot.slane %v1173_v49, 4  ;;  %v1178_v60 = vrot.slane %v1176_v35, 5  ;;  %v1187_v61 = vshrl.u32 %v3855_v55, 16 }
 0x201   : > { %v3930_v40 = vcombine.low %v1129_v56, %v1143_v25  ;;  %v1110_v4 = vrot.slane %v1109_v7, 4  ;;  %v1245_v10 = vor.u32 %v1244_v52, %v1241_v9  ;;  %v1250_v12 = vrot.slane %v1248_v5, 5  ;;  %v1089_v9 = vld [vmem:[%s3485_s22 + $0x44] sm:$0x1]  ;;  %s3128_s6 = spop.drf %3127 }
 0x202   : > { %v1179_v13 = vor.u32 %v1178_v60, %v1175_v59  ;;  %v1189_v18 = vrot.slane %v1187_v61, 4  ;;  %v1190_v46 = vshll.u32 %v3855_v55, 16  ;;  %v1196_v19 = vshll.u32 %v3867_v57, 16  ;;  %s1652_s10 = ssub.s32 0, %s3128_s6 }
 0x203   : > { %1348 = vrot.lane.b32.xlu1 %v3930_v40, %s3295_s13  ;;  %v1115_v23 = vsel %vm3911_vm6, %v1110_v4, %v1114_v43  ;;  %v1246_v26 = vrot.slane %v1245_v10, 4  ;;  %v1145_v63 = vshrl.u32 %v3785_v29, 16  ;;  %v1148_v24 = vshll.u32 %v3785_v29, 16  ;;  %v3953_v43 = vld [vmem:[%s3485_s22 + $0x40] sm:$0xf]  ;;  %s4447_s10 = smov (!%p1093_p0, %s1652_s10), %s3128_s6 }
 0x204   : > { %v1168_v2 = vshll.u32 %v3794_v32, 16  ;;  %v1180_v5 = vrot.slane %v1179_v13, 4  ;;  %v1184_v27 = vrot.slane %v1182_v58, 5  ;;  %v1192_v28 = vrot.slane %v1190_v46, 5 }
 0x205   : > { %v1251_v57 = vsel %vm3911_vm6, %v1246_v26, %v1250_v12  ;;  %v1147_v34 = vrot.slane %v1145_v63, 4  ;;  %v1150_v6 = vrot.slane %v1148_v24, 5  ;;  %v1159_v33 = vshrl.u32 %v3791_v30, 16 }
 0x206   : > { %v2787_v22 = vcombine.low %v1251_v57, %v1115_v23  ;;  %v1193_v37 = vor.u32 %v1192_v28, %v1189_v18  ;;  %v1198_v39 = vrot.slane %v1196_v19, 5  ;;  %v1162_v11 = vshll.u32 %v3791_v30, 16 }
 0x207   : > { %v1151_v32 = vor.u32 %v1150_v6, %v1147_v34  ;;  %v1156_v15 = vrot.slane %v1154_v31, 5  ;;  %v1161_v48 = vrot.slane %v1159_v33, 4  ;;  %v1185_v49 = vsel %vm3911_vm6, %v1180_v5, %v1184_v27 }
 0x208   : > { %1346 = vrot.lane.b32.xlu0 %v2787_v22, %s3295_s13  ;;  %v1194_v35 = vrot.slane %v1193_v37, 4  ;;  %v1164_v7 = vrot.slane %v1162_v11, 5  ;;  %v1170_v52 = vrot.slane %v1168_v2, 5  ;;  %v2767_v59 = vcombine.low %v1115_v23, %v1129_v56  ;;  %v1090_v22 = vld [vmem:[%s3485_s22 + $0x48] sm:$0xf] }
 0x209   : > { %v1152_v58 = vrot.slane %v1151_v32, 4  ;;  %v1201_v60 = vshrl.u32 %v3953_v43, 16  ;;  %v1204_v61 = vshll.u32 %v3953_v43, 16  ;;  %vm1233_vm7 = vcmask 31744  }
 0x20a   : > { %v1199_v21 = vsel %vm3911_vm6, %v1194_v35, %v1198_v39  ;;  %v1165_v31 = vor.u32 %v1164_v7, %v1161_v48  ;;  %v1210_v4 = vshll.u32 %v1089_v9, 16  ;;  %1234 = vst.msk [vmem:[%s1232_s17] sm:$0xff] %vm1233_vm7, %v2767_v59  ;;  %v2797_v19 = vcombine.low %v3791_v30, %v3797_v36 }
 0x20b   : > { %v3965_v10 = vcombine.low %v1185_v49, %v1199_v21  ;;  %v1157_v12 = vsel %vm3911_vm6, %v1152_v58, %v1156_v15  ;;  %v1203_v13 = vrot.slane %v1201_v60, 4  ;;  %v1206_v56 = vrot.slane %v1204_v61, 5 }
 0x20c   : > { %v1166_v18 = vrot.slane %v1165_v31, 4  ;;  %v2768_v46 = vcombine.low %v1143_v25, %v1157_v12  ;;  %v1212_v26 = vrot.slane %v1210_v4, 5  ;;  %v2795_v25 = vcombine.low %v3841_v45, %v3851_v54 }
 0x20d   : > { %1352 = vrot.lane.b32.xlu1 %v3965_v10, %s3295_s13  ;;  %v1207_v23 = vor.u32 %v1206_v56, %v1203_v13  ;;  %v2798_v30 = vcombine.low %v3855_v55, %v3953_v43  ;;  %v2783_v28 = vcombine.low %v3831_v3, %v3841_v45  ;;  %v2796_v34 = vcombine.low %v3815_v14, %v3785_v29 }
 0x20e   : > { %v1171_v63 = vsel %vm3911_vm6, %v1166_v18, %v1170_v52  ;;  %1235 = vst.msk [vmem:[%s1232_s17 + $0x8] sm:$0xff] %vm1233_vm7, %v2768_v46  ;;  %v2781_v6 = vrot.slane %v3953_v43, 9  ;;  %v1307_v33 = vrot.slane %v1089_v9, 5  ;;  %v2801_v37 = vcombine.low %v3828_v42, %v3848_v50 }
 0x20f   : > { %v3977_v24 = vcombine.low %v1157_v12, %v1171_v63  ;;  %v2769_v2 = vcombine.low %v1171_v63, %v1185_v49  ;;  %v1208_v5 = vrot.slane %v1207_v23, 4  ;;  %v1310_v11 = vshrl.u32 %v1090_v22, 16  ;;  %v1091_v49 = vld [vmem:[%s3485_s22 + $0x4c] sm:$0x1] }
 0x210   : > { %v1308_v39 = vsel %vm3806_vm3, %v2781_v6, %v1307_v33  ;;  %v1313_v32 = vshll.u32 %v1090_v22, 16  ;;  %v2799_v29 = vcombine.low %v3876_v62, %v3880_v38  ;;  %v2800_v42 = vcombine.low %v3861_v53, %v3824_v41  ;;  %v3124_v62 = vld [vmem:[%s4367_s3] sm:$0xff]  }
 0x211   : > { %1350 = vrot.lane.b32.xlu0 %v3977_v24, %s3295_s13  ;;  %1383 = vrot.lane.b32.xlu1 %v2797_v19, %s3296_s19  ;;  %1236 = vst.msk [vmem:[%s1232_s17 + $0x10] sm:$0xff] %vm1233_vm7, %v2769_v2  ;;  %v1213_v27 = vsel %vm3911_vm6, %v1208_v5, %v1212_v26  ;;  %v2802_v15 = vcombine.low %v3888_v8, %v1308_v39  ;;  %v1312_v48 = vrot.slane %v1310_v11, 4  ;;  %v1319_v7 = vshll.u32 %v1091_v49, 16  ;;  %s2874_s13 = sshll.u32 %s4447_s10, 5 }
 0x212   : > { %v2770_v57 = vcombine.low %v1199_v21, %v1213_v27  ;;  %v1315_v9 = vrot.slane %v1313_v32, 5  ;;  %v4007_v50 = vcombine.low %v3797_v36, %v3855_v55  ;;  %v4015_v38 = vcombine.low %v3851_v54, %v3815_v14  ;;  %2927 = vmatprep.subr.bf16.mxu0 %v3124_v62  ;;  %2987 = vmatprep.subr.bf16.mxu1 %v3124_v62  ;;  %v3125_v36 = vld [vmem:[%s4367_s3 + $0x8] sm:$0xff]   ;;  %v3126_v14 = vld [vmem:[%s4367_s3 + $0x10] ss:$0 sps:$4 sm:$0x33]   ;;  %s1656_s15 = scalar_lea.vmem [#allocation2], %s2874_s13 }
 0x213   : > { %v2803_v41 = vcombine.low %v3953_v43, %v1090_v22  ;;  %v1321_v8 = vrot.slane %v1319_v7, 5  ;;  %2928 = vmatpush3.bf16.msra.mxu0 %v3124_v62  ;;  %2990 = vmatpush3.bf16.msra.mxu1 %v3124_v62  ;;  %vm1542_vm8 = vcmask 1041408   ;;  %v2782_v52 = vrot.slane %v1090_v22, 9 }
 0x214   : > { %1237 = vst.msk [vmem:[%s1232_s17 + $0x18] sm:$0xff] %vm1233_vm7, %v2770_v57  ;;  %v1316_v35 = vor.u32 %v1315_v9, %v1312_v48  ;;  %2929 = vmatprep.subr.bf16.mxu0 %v3125_v36  ;;  %2988 = vmatprep.subr.bf16.mxu1 %v3125_v36  ;;  %v1544_v43 = vsel %vm1542_vm8, %v3126_v14, 0  ;;  %v1327_v58 = vrot.slane %v1091_v49, 5  ;;  %vm1459_vm9 = vcmask 97280  }
 0x215   : > { %1379 = vrot.lane.b32.xlu0 %v2795_v25, %s3296_s19  ;;  %1385 = vrot.lane.b32.xlu1 %v2798_v30, %s3296_s19  ;;  %vm1450_vm10 = vcmask 64512   ;;  %vm1468_vm11 = vcmask 130048   ;;  %vm1477_vm12 = vcmask 162816   ;;  %vm1486_vm13 = vcmask 195584  }
 0x216   : > { %v1317_v53 = vrot.slane %v1316_v35, 4  ;;  %v1328_v51 = vsel %vm3806_vm3, %v2782_v52, %v1327_v58  ;;  %vm1495_vm14 = vcmask 228352   ;;  %vm1504_vm15 = vcmask 261120  }
 0x217   : > { %2930 = vmatpush3.bf16.msra.mxu0 %v3125_v36  ;;  %2991 = vmatpush3.bf16.msra.mxu1 %v3125_v36  ;;  %vm1533_vm0 = vcmask 293888   ;;  %vm1657_vm1 = vcmask 72704  }
 0x218   : > { %v1322_v55 = vsel %vm3911_vm6, %v1317_v53, %v1321_v8  ;;  %3003 = vmatprep.subr.msk.bf16.mxu0 %vm1542_vm8, %v3126_v14  ;;  %3004 = vmatprep.subr.msk.bf16.mxu1 %vm1542_vm8, %v3126_v14 }
 0x219   : > { %1381 = vrot.lane.b32.xlu0 %v2796_v34, %s3296_s19  ;;  %1391 = vrot.lane.b32.xlu1 %v2769_v2, %s3297_s27  ;;  %v2804_v54 = vcombine.low %v1213_v27, %v1322_v55 }
 0x21b   : > { %2932 = vmatpush3.bf16.msra.mxu0 %v1544_v43  ;;  %2992 = vmatpush3.bf16.msra.mxu1 %v1544_v43 }
 0x21d   : > { %1387 = vrot.lane.b32.xlu0 %v2767_v59, %s3297_s27  ;;  %1393 = vrot.lane.b32.xlu1 %v2770_v57, %s3297_s27  ;;  %v2805_v59 = vcombine.low %v1308_v39, %v1328_v51 }
 0x221   : > { %1389 = vrot.lane.b32.xlu0 %v2768_v46, %s3297_s27  ;;  %1404 = vrot.lane.b32.xlu1 %v2801_v37, %s3298_s28 }
 0x225   : > { %1400 = vrot.lane.b32.xlu0 %v2799_v29, %s3298_s28  ;;  %1406 = vrot.lane.b32.xlu1 %v2802_v15, %s3298_s28 }
 0x229   : > { %1402 = vrot.lane.b32.xlu0 %v2800_v42, %s3298_s28  ;;  %1414 = vrot.lane.b32.xlu1 %v4007_v50, %s3299_s30 }
 0x22d   : > { %1410 = vrot.lane.b32.xlu0 %v4015_v38, %s3299_s30  ;;  %1416 = vrot.lane.b32.xlu1 %v2803_v41, %s3299_s30 }
 0x231   : > { %1412 = vrot.lane.b32.xlu0 %v3804_v47, %s3299_s30  ;;  %1424 = vrot.lane.b32.xlu1 %v3965_v10, %s3300_s26 }
 0x235   : > { %1420 = vrot.lane.b32.xlu0 %v3930_v40, %s3300_s26  ;;  %1426 = vrot.lane.b32.xlu1 %v2804_v54, %s3300_s26 }
 0x239   : > { %1422 = vrot.lane.b32.xlu0 %v3977_v24, %s3300_s26  ;;  %1434 = vrot.lane.b32.xlu1 %v3899_v17, %s3301_s0 }
 0x23d   : > { %1430 = vrot.lane.b32.xlu0 %v3892_v16, %s3301_s0  ;;  %1436 = vrot.lane.b32.xlu1 %v2805_v59, %s3301_s0 }
 0x241   : > { %1432 = vrot.lane.b32.xlu0 %v3838_v44, %s3301_s0 }
 0x267   : > { %v1371_v60 = vpop.permute.xlu1 %1370 }
 0x26c   : > { %v1367_v61 = vpop.permute.xlu0 %1366 }
 0x26d   : > { %v1373_v21 = vpop.permute.xlu1 %1372 }
 0x270   : > { %v1369_v31 = vpop.permute.xlu0 %1368 }
 0x275   : > { %v1349_v40 = vpop.permute.xlu1 %1348 }
 0x27a   : > { %v1347_v4 = vpop.permute.xlu0 %1346 }
 0x27b   : > { %v1440_v34 = vsel %vm1233_vm7, %v2783_v28, %v1347_v4  ;;  %v1443_v28 = vsel %vm1233_vm7, %v4015_v38, %v1349_v40 }
 0x27c   : > { %v1452_v11 = vsel %vm1450_vm10, %v1440_v34, %v1367_v61  ;;  %v1454_v62 = vsel %vm1450_vm10, %v1443_v28, %v1369_v31 }
 0x27f   : > { %v1353_v10 = vpop.permute.xlu1 %1352 }
 0x280   : > { %v1449_v6 = vsel %vm1233_vm7, %v4007_v50, %v1353_v10 }
 0x281   : > { %v1458_v3 = vsel %vm1450_vm10, %v1449_v6, %v1373_v21  ;;  %v1611_v21 = vlaneseq }
 0x283   : > { %v1351_v20 = vpop.permute.xlu0 %1350  ;;  %v1384_v12 = vpop.permute.xlu1 %1383  ;;  %v1612_v31 = vshrl.u32 %v1611_v21, 7 }
 0x284   : > { %v1446_v25 = vsel %vm1233_vm7, %v3804_v47, %v1351_v20 }
 0x285   : > { %v1456_v57 = vsel %vm1450_vm10, %v1446_v25, %v1371_v60  ;;  %v1613_v40 = vsub.s32 0, %v1612_v31 }
 0x286   : > { %v1465_v33 = vsel %vm1459_vm9, %v1456_v57, %v1384_v12 }
 0x287   : > { %v1380_v13 = vpop.permute.xlu0 %1379  ;;  %v1386_v56 = vpop.permute.xlu1 %1385  ;;  %v1614_v4 = vrot.slane %v3456_v0, %v1613_v40  ;;  %v1626_v10 = vrot.slane %v3461_v1, %v1613_v40 }
 0x288   : > { %v1461_v32 = vsel %vm1459_vm9, %v1452_v11, %v1380_v13  ;;  %v1467_v29 = vsel %vm1459_vm9, %v1458_v3, %v1386_v56 }
 0x28b   : > { %v1382_v18 = vpop.permute.xlu0 %1381  ;;  %v1392_v46 = vpop.permute.xlu1 %1391 }
 0x28c   : > { %v1474_v37 = vsel %vm1468_vm11, %v1465_v33, %v1392_v46  ;;  %v1463_v53 = vsel %vm1459_vm9, %v1454_v62, %v1382_v18 }
 0x28f   : > { %v1388_v17 = vpop.permute.xlu0 %1387  ;;  %v1394_v19 = vpop.permute.xlu1 %1393 }
 0x290   : > { %v1470_v49 = vsel %vm1468_vm11, %v1461_v32, %v1388_v17  ;;  %v1476_v42 = vsel %vm1468_vm11, %v1467_v29, %v1394_v19 }
 0x293   : > { %v1390_v23 = vpop.permute.xlu0 %1389  ;;  %v1405_v16 = vpop.permute.xlu1 %1404 }
 0x294   : > { %v1483_v39 = vsel %vm1477_vm12, %v1474_v37, %v1405_v16  ;;  %v1472_v54 = vsel %vm1468_vm11, %v1463_v53, %v1390_v23 }
 0x297   : > { %v1401_v26 = vpop.permute.xlu0 %1400  ;;  %v1407_v63 = vpop.permute.xlu1 %1406 }
 0x298   : > { %v1479_v35 = vsel %vm1477_vm12, %v1470_v49, %v1401_v26  ;;  %v1485_v7 = vsel %vm1477_vm12, %v1476_v42, %v1407_v63 }
 0x29b   : > { %v1403_v44 = vpop.permute.xlu0 %1402  ;;  %v1415_v24 = vpop.permute.xlu1 %1414 }
 0x29c   : > { %v1492_v45 = vsel %vm1486_vm13, %v1483_v39, %v1415_v24  ;;  %v1481_v58 = vsel %vm1477_vm12, %v1472_v54, %v1403_v44 }
 0x29f   : > { %v1411_v2 = vpop.permute.xlu0 %1410  ;;  %v1417_v5 = vpop.permute.xlu1 %1416 }
 0x2a0   : > { %v1488_v38 = vsel %vm1486_vm13, %v1479_v35, %v1411_v2  ;;  %v1494_v41 = vsel %vm1486_vm13, %v1485_v7, %v1417_v5 }
 0x2a3   : > { %v1413_v30 = vpop.permute.xlu0 %1412  ;;  %v1425_v27 = vpop.permute.xlu1 %1424 }
 0x2a4   : > { %v1501_v15 = vsel %vm1495_vm14, %v1492_v45, %v1425_v27  ;;  %v1490_v51 = vsel %vm1486_vm13, %v1481_v58, %v1413_v30 }
 0x2a7   : > { %v1421_v47 = vpop.permute.xlu0 %1420  ;;  %v1427_v22 = vpop.permute.xlu1 %1426 }
 0x2a8   : > { %v1497_v8 = vsel %vm1495_vm14, %v1488_v38, %v1421_v47  ;;  %v1503_v36 = vsel %vm1495_vm14, %v1494_v41, %v1427_v22 }
 0x2ab   : > { %v1423_v48 = vpop.permute.xlu0 %1422  ;;  %v1435_v9 = vpop.permute.xlu1 %1434 }
 0x2ac   : > { %v1510_v50 = vsel %vm1504_vm15, %v1501_v15, %v1435_v9  ;;  %v1499_v59 = vsel %vm1495_vm14, %v1490_v51, %v1423_v48 }
 0x2ad   : > { %2937 = vmatprep.mubr.msk.bf16.mxu1 %vm1533_vm0, %v1510_v50 }
 0x2af   : > { %v1431_v55 = vpop.permute.xlu0 %1430  ;;  %v1437_v14 = vpop.permute.xlu1 %1436 }
 0x2b0   : > { %v1506_v43 = vsel %vm1504_vm15, %v1497_v8, %v1431_v55  ;;  %v1512_v52 = vsel %vm1504_vm15, %v1503_v36, %v1437_v14 }
 0x2b1   : > { %2933 = vmatprep.mubr.msk.bf16.mxu0 %vm1533_vm0, %v1506_v43  ;;  %2938 = vmatmul.mubr.msk.bf16.vlgmr.msra.gmra.mrb[0].mxu1 %vm1533_vm0, %v1512_v52 }
 0x2b3   : > { %v1433_v60 = vpop.permute.xlu0 %1432 }
 0x2b4   : > { %v1508_v61 = vsel %vm1504_vm15, %v1499_v59, %v1433_v60 }
 0x2b5   : > { %2934 = vmatmul.mubr.msk.bf16.vlgmr.msra.gmra.mrb[0].mxu0 %vm1533_vm0, %v1508_v61 }
 0x384   : > { %v2939_v20 = vpop.f32.mrb[0].mxu1 }
 0x385   : > { %v1621_v12 = vmul.f32 %v2939_v20, %v1614_v4  ;;  %v1596_v13 = vpop.f32.mrb[1].mxu1 }
 0x386   : > { %v1619_v56 = vmul.f32 %v1614_v4, %v1596_v13  ;;  %v2940_v18 = vpop.f32.mrb[2].mxu1 }
 0x387   : > { %v1633_v46 = vadd.f32 %v1626_v10, %v1621_v12  ;;  %v1622_v17 = vmul.f32 %v2940_v18, %v1614_v4  ;;  %v1599_v19 = vpop.f32.mrb[3].mxu1 }
 0x388   : > { %v2935_v23 = vpop.f32.mrb[0].mxu0  ;;  %v1631_v16 = vadd.f32 %v1626_v10, %v1619_v56  ;;  %v1620_v26 = vmul.f32 %v1614_v4, %v1599_v19 }
 0x389   : > { %v1617_v63 = vmul.f32 %v2935_v23, %v1614_v4  ;;  %v1580_v0 = vpop.f32.mrb[1].mxu0  ;;  %v1634_v44 = vadd.f32 %v1626_v10, %v1622_v17  ;;  %v1641_v25 = vmax.f32 %v1633_v46, 0.0 }
 0x38a   : > { %v1615_v1 = vmul.f32 %v1614_v4, %v1580_v0  ;;  %v2936_v24 = vpop.f32.mrb[2].mxu0  ;;  %v1632_v2 = vadd.f32 %v1626_v10, %v1620_v26  ;;  %v1639_v6 = vmax.f32 %v1631_v16, 0.0 }
 0x38b   : > { %v1629_v5 = vadd.f32 %v1626_v10, %v1617_v63  ;;  %v1618_v30 = vmul.f32 %v2936_v24, %v1614_v4  ;;  %v1642_v27 = vmax.f32 %v1634_v44, 0.0  ;;  %v1583_v57 = vpop.f32.mrb[3].mxu0 }
 0x38c   : > { %v1627_v34 = vadd.f32 %v1626_v10, %v1615_v1  ;;  %v1616_v33 = vmul.f32 %v1614_v4, %v1583_v57  ;;  %v1640_v47 = vmax.f32 %v1632_v2, 0.0 }
 0x38d   : > { %v1630_v22 = vadd.f32 %v1626_v10, %v1618_v30  ;;  %v1646_v37 = vpack.c.bf16 %v1642_v27, %v1641_v25  ;;  %v1637_v3 = vmax.f32 %v1629_v5, 0.0 }
 0x38e   : > { %v1628_v39 = vadd.f32 %v1626_v10, %v1616_v33  ;;  %v1645_v11 = vpack.c.bf16 %v1640_v47, %v1639_v6  ;;  %v1635_v28 = vmax.f32 %v1627_v34, 0.0 }
 0x38f   : > { %v1638_v45 = vmax.f32 %v1630_v22, 0.0  ;;  %1661 = vst.msk [vmem:[%s1656_s15 + $0x18] sm:$0xff] %vm1657_vm1, %v1646_v37 }
 0x390   : > { %v1636_v32 = vmax.f32 %v1628_v39, 0.0  ;;  %1660 = vst.msk [vmem:[%s1656_s15 + $0x10] sm:$0xff] %vm1657_vm1, %v1645_v11 }
 0x391   : > { %v1644_v29 = vpack.c.bf16 %v1638_v45, %v1637_v3 }
 0x392   : > { %v1643_v15 = vpack.c.bf16 %v1636_v32, %v1635_v28 }
 0x393   : > { %1659 = vst.msk [vmem:[%s1656_s15 + $0x8] sm:$0xff] %vm1657_vm1, %v1644_v29 }
 0x394   : > { %1658 = vst.msk [vmem:[%s1656_s15] sm:$0xff] %vm1657_vm1, %v1643_v15 }
 0x395 PF: > { %v3129_v48 = vld [vmem:[%s4368_s4 + $0x8] sm:$0x1f]   ;;  %vm1697_vm2 = vcmask 1043456   ;;  %vm1698_vm3 = vcmask 1044480   ;;  %s1663_s27 = ssub.s32 0, %s3267_s16  ;;  %v3302_v9 = vmov 65535  }
 0x396   : > { %v1699_v49 = vsel %vm1697_vm2, 4294967295, %v3302_v9  ;;  %s4094_s28 = smin.u32 %s3267_s16, %s1663_s27  ;;  %p1662_p1 = scmp.lt.s32.totalorder %s3267_s16, 0  ;;  %vm1684_vm4 = vcmask 72704   ;;  %vm1769_vm5 = vcmask 31744  }
 0x397   : > { %v4096_v42 = vsel %vm1698_vm3, %v1699_v49, 0  ;;  %3130 = sdivrem.u32 %s4094_s28, 3  ;;  %p2826_p2 = scmp.le.s32.totalorder %s3267_s16, 0 }
 0x398   : > { %v1702_v50 = vand.u32 %v3129_v48, %v4096_v42  ;;  %v3132_v52 = vld [vmem:[%s4368_s4] sm:$0x1f] (!%p2826_p2)   ;;  %s1790_s21 = sadd.s32 (!%p2826_p2), 2, %s3267_s16 }
 0x399   : > { %v1825_v58 = vand.u32 (!%p2826_p2), %v3132_v52, %v4096_v42  ;;  %s1792_s26 = ssub.s32 (!%p2826_p2), 0, %s1790_s21  ;;  %p1791_p4 = scmp.lt.s32.totalorder (!%p2826_p2), %s1790_s21, 0 }
 0x39a   : > { %2941 = vmatprep.subr.bf16.mxu0 %v1702_v50  ;;  %2993 = vmatprep.subr.bf16.mxu1 %v1702_v50  ;;  %s2827_s0 = smin.u32 (!%p2826_p2), %s1792_s26, %s1790_s21 }
 0x39b   : > { %2942 = vmatpush3.bf16.msra.mxu0 %v1702_v50  ;;  %2994 = vmatpush3.bf16.msra.mxu1 %v1702_v50  ;;  %3133 = sdivrem.u32 (!%p2826_p2), %s2827_s0, 3 }
 0x39c   : > { %2951 = vmatprep.subr.bf16.mxu0 (!%p2826_p2), %v1825_v58  ;;  %2995 = vmatprep.subr.bf16.mxu1 (!%p2826_p2), %v1825_v58 }
 0x3a0   : > { %s3131_s25 = spop.drf %3130 }
 0x3a1   : > { %s1667_s18 = ssub.s32 0, %s3131_s25 }
 0x3a2   : > { %s4449_s18 = smov (!%p1662_p1, %s1667_s18), %s3131_s25 }
 0x3a3   : > { %s2875_s30 = sshll.u32 %s4449_s18, 5 }
 0x3a4   : > { %s1671_s22 = scalar_lea.vmem [#allocation2], %s2875_s30  ;;  %s3134_s6 = spop.drf (!%p2826_p2), %3133 }
 0x3a5   : > { %v1672_v35 = vld [vmem:[%s1671_s22] sm:$0xff]  ;;  %v1674_v7 = vld [vmem:[%s1671_s22 + $0x10] sm:$0xff]  ;;  %v1673_v62 = vld [vmem:[%s1671_s22 + $0x8] sm:$0xff]  ;;  %s1796_s10 = ssub.s32 (!%p2826_p2), 0, %s3134_s6 }
 0x3a6   : > { %2943 = vmatprep.mubr.msk.bf16.mxu0 %vm1684_vm4, %v1672_v35  ;;  %2947 = vmatprep.mubr.msk.bf16.mxu1 %vm1684_vm4, %v1674_v7  ;;  %v1675_v38 = vld [vmem:[%s1671_s22 + $0x18] sm:$0xff] }
 0x3a7   : > { %2944 = vmatmul.mubr.msk.bf16.vlgmr.msra.gmra.mrb[0].mxu0 %vm1684_vm4, %v1673_v62  ;;  %2948 = vmatmul.mubr.msk.bf16.vlgmr.msra.gmra.mrb[0].mxu1 %vm1684_vm4, %v1675_v38 }
 0x3a8   : > { %2952 = vmatpush3.bf16.msra.mxu0 (!%p2826_p2), %v1825_v58  ;;  %2996 = vmatpush3.bf16.msra.mxu1 (!%p2826_p2), %v1825_v58 }
 0x478   : > { %1781 = sbr.rel (%p2826_p2) target bundleno = 1374 (0x55e), region = 72 }
 0x47a   : > { %v2945_v41 = vpop.f32.mrb[0].mxu0  ;;  %v2949_v53 = vpop.f32.mrb[0].mxu1 }
 0x47b   : > { %1772 = vst.msk [vmem:[#allocation4 + $0x10] sm:$0xff] %vm1769_vm5, %v2945_v41  ;;  %1776 = vst.msk [vmem:[#allocation4 + $0x30] sm:$0xff] %vm1769_vm5, %v2949_v53  ;;  %v1738_v8 = vpop.f32.mrb[1].mxu0  ;;  %v1754_v36 = vpop.f32.mrb[1].mxu1 }
 0x47c   : > { %1770 = vst.msk [vmem:[#allocation4] sm:$0xff] %vm1769_vm5, %v1738_v8  ;;  %1774 = vst.msk [vmem:[#allocation4 + $0x20] sm:$0xff] %vm1769_vm5, %v1754_v36  ;;  %v2946_v55 = vpop.f32.mrb[2].mxu0  ;;  %v2950_v14 = vpop.f32.mrb[2].mxu1 }
 0x47d   : > { %1773 = vst.msk [vmem:[#allocation4 + $0x18] sm:$0xff] %vm1769_vm5, %v2946_v55  ;;  %1777 = vst.msk [vmem:[#allocation4 + $0x38] sm:$0xff] %vm1769_vm5, %v2950_v14  ;;  %v1741_v54 = vpop.f32.mrb[3].mxu0  ;;  %v1757_v43 = vpop.f32.mrb[3].mxu1 }
 0x47e   : > { %1771 = vst.msk [vmem:[#allocation4 + $0x8] sm:$0xff] %vm1769_vm5, %v1741_v54  ;;  %1775 = vst.msk [vmem:[#allocation4 + $0x28] sm:$0xff] %vm1769_vm5, %v1757_v43 }
 0x47f   : > { %s4451_s10 = smov (!%p1791_p4, %s1796_s10), %s3134_s6 }
 0x480   : > { %s2876_s13 = sshll.u32 %s4451_s10, 5 }
 0x481   : > { %s1800_s15 = scalar_lea.vmem [#allocation2], %s2876_s13 }
 0x482   : > { %v1801_v51 = vld [vmem:[%s1800_s15] sm:$0xff]  ;;  %v1803_v59 = vld [vmem:[%s1800_s15 + $0x10] sm:$0xff]  ;;  %v1802_v60 = vld [vmem:[%s1800_s15 + $0x8] sm:$0xff] }
 0x483   : > { %2953 = vmatprep.mubr.msk.bf16.mxu0 %vm1684_vm4, %v1801_v51  ;;  %2957 = vmatprep.mubr.msk.bf16.mxu1 %vm1684_vm4, %v1803_v59  ;;  %v1804_v61 = vld [vmem:[%s1800_s15 + $0x18] sm:$0xff]  ;;  %v1784_v21 = vld [vmem:[#allocation4 + $0x10] sm:$0xff]  ;;  %v1782_v40 = vld [vmem:[#allocation4] sm:$0xff] }
 0x484   : > { %2954 = vmatmul.mubr.msk.bf16.vlgmr.msra.gmra.mrb[0].mxu0 %vm1684_vm4, %v1802_v60  ;;  %2958 = vmatmul.mubr.msk.bf16.vlgmr.msra.gmra.mrb[0].mxu1 %vm1684_vm4, %v1804_v61  ;;  %v1788_v31 = vld [vmem:[#allocation4 + $0x30] sm:$0xff]  ;;  %v1786_v4 = vld [vmem:[#allocation4 + $0x20] sm:$0xff]  ;;  %v1785_v12 = vld [vmem:[#allocation4 + $0x18] sm:$0xff] }
 0x485   : > { %v1789_v13 = vld [vmem:[#allocation4 + $0x38] sm:$0xff]  ;;  %v1783_v19 = vld [vmem:[#allocation4 + $0x8] sm:$0xff] }
 0x486   : > { %v1787_v23 = vld [vmem:[#allocation4 + $0x28] sm:$0xff] }
 0x557   : > { %v2955_v10 = vpop.f32.mrb[0].mxu0  ;;  %v2959_v20 = vpop.f32.mrb[0].mxu1 }
 0x558   : > { %v1894_v56 = vadd.f32 %v2955_v10, %v1784_v21  ;;  %v1898_v18 = vadd.f32 %v2959_v20, %v1788_v31  ;;  %v1861_v46 = vpop.f32.mrb[1].mxu0  ;;  %v1877_v17 = vpop.f32.mrb[1].mxu1 }
 0x559   : > { %v1892_v16 = vadd.f32 %v1861_v46, %v1782_v40  ;;  %v1896_v26 = vadd.f32 %v1877_v17, %v1786_v4  ;;  %v2956_v63 = vpop.f32.mrb[2].mxu0  ;;  %v2960_v0 = vpop.f32.mrb[2].mxu1 }
 0x55a   : > { %1902 = vst.msk [vmem:[#allocation4 + $0x10] sm:$0xff] %vm1769_vm5, %v1894_v56  ;;  %1906 = vst.msk [vmem:[#allocation4 + $0x30] sm:$0xff] %vm1769_vm5, %v1898_v18  ;;  %v1895_v44 = vadd.f32 %v2956_v63, %v1785_v12  ;;  %v1899_v1 = vadd.f32 %v2960_v0, %v1789_v13  ;;  %v1864_v24 = vpop.f32.mrb[3].mxu0  ;;  %v1880_v2 = vpop.f32.mrb[3].mxu1 }
 0x55b   : > { %1900 = vst.msk [vmem:[#allocation4] sm:$0xff] %vm1769_vm5, %v1892_v16  ;;  %1904 = vst.msk [vmem:[#allocation4 + $0x20] sm:$0xff] %vm1769_vm5, %v1896_v26  ;;  %v1893_v5 = vadd.f32 %v1864_v24, %v1783_v19  ;;  %v1897_v25 = vadd.f32 %v1880_v2, %v1787_v23 }
 0x55c   : > { %1903 = vst.msk [vmem:[#allocation4 + $0x18] sm:$0xff] %vm1769_vm5, %v1895_v44  ;;  %1907 = vst.msk [vmem:[#allocation4 + $0x38] sm:$0xff] %vm1769_vm5, %v1899_v1 }
 0x55d   : > { %1901 = vst.msk [vmem:[#allocation4 + $0x8] sm:$0xff] %vm1769_vm5, %v1893_v5  ;;  %1905 = vst.msk [vmem:[#allocation4 + $0x28] sm:$0xff] %vm1769_vm5, %v1897_v25 }
 0x55e PF: > { %1910 = sbr.rel (%p2765_p13) target bundleno = 1610 (0x64a), region = 76  ;;  %v3135_v30 = vld [vmem:[%s4368_s4 + $0x10] sm:$0x1f] (!%p2765_p13)   ;;  %s1921_s27 = ssub.s32 (!%p2765_p13), 0, %s3464_s11 }
 0x55f   : > { %v1955_v27 = vand.u32 (!%p2765_p13), %v3135_v30, %v4096_v42  ;;  %s2836_s25 = smin.u32 (!%p2765_p13), %s1921_s27, %s3464_s11  ;;  %p1920_p5 = scmp.lt.s32.totalorder (!%p2765_p13), %s3464_s11, 0 }
 0x560   : > { %3136 = sdivrem.u32 (!%p2765_p13), %s2836_s25, 3 }
 0x561   : > { %2961 = vmatprep.subr.bf16.mxu0 (!%p2765_p13), %v1955_v27  ;;  %2997 = vmatprep.subr.bf16.mxu1 (!%p2765_p13), %v1955_v27  ;;  %v1913_v47 = vld [vmem:[#allocation4 + $0x10] sm:$0xff] (!%p2765_p13) }
 0x562   : > { %2962 = vmatpush3.bf16.msra.mxu0 (!%p2765_p13), %v1955_v27  ;;  %2998 = vmatpush3.bf16.msra.mxu1 (!%p2765_p13), %v1955_v27  ;;  %v1917_v22 = vld [vmem:[#allocation4 + $0x30] sm:$0xff] (!%p2765_p13)  ;;  %v1911_v37 = vld [vmem:[#allocation4] sm:$0xff] (!%p2765_p13) }
 0x563   : > { %v1915_v39 = vld [vmem:[#allocation4 + $0x20] sm:$0xff] (!%p2765_p13)  ;;  %v1914_v45 = vld [vmem:[#allocation4 + $0x18] sm:$0xff] (!%p2765_p13) }
 0x564   : > { %v1918_v28 = vld [vmem:[#allocation4 + $0x38] sm:$0xff] (!%p2765_p13)  ;;  %v1912_v9 = vld [vmem:[#allocation4 + $0x8] sm:$0xff] (!%p2765_p13) }
 0x565   : > { %v1916_v49 = vld [vmem:[#allocation4 + $0x28] sm:$0xff] }
 0x569   : > { %s3137_s18 = spop.drf %3136 }
 0x56a   : > { %s1925_s30 = ssub.s32 0, %s3137_s18 }
 0x56b   : > { %s4453_s30 = smov (!%p1920_p5, %s1925_s30), %s3137_s18 }
 0x56c   : > { %s2877_s22 = sshll.u32 %s4453_s30, 5 }
 0x56d   : > { %s1929_s8 = scalar_lea.vmem [#allocation2], %s2877_s22 }
 0x56e   : > { %v1930_v57 = vld [vmem:[%s1929_s8] sm:$0xff]  ;;  %v1932_v34 = vld [vmem:[%s1929_s8 + $0x10] sm:$0xff]  ;;  %v1931_v6 = vld [vmem:[%s1929_s8 + $0x8] sm:$0xff] }
 0x56f   : > { %2963 = vmatprep.mubr.msk.bf16.mxu0 %vm1684_vm4, %v1930_v57  ;;  %2967 = vmatprep.mubr.msk.bf16.mxu1 %vm1684_vm4, %v1932_v34  ;;  %v1933_v33 = vld [vmem:[%s1929_s8 + $0x18] sm:$0xff] }
 0x570   : > { %2964 = vmatmul.mubr.msk.bf16.vlgmr.msra.gmra.mrb[0].mxu0 %vm1684_vm4, %v1931_v6  ;;  %2968 = vmatmul.mubr.msk.bf16.vlgmr.msra.gmra.mrb[0].mxu1 %vm1684_vm4, %v1933_v33 }
 0x643   : > { %v2965_v11 = vpop.f32.mrb[0].mxu0  ;;  %v2969_v3 = vpop.f32.mrb[0].mxu1 }
 0x644   : > { %v2024_v32 = vadd.f32 %v2965_v11, %v1913_v47  ;;  %v2028_v29 = vadd.f32 %v2969_v3, %v1917_v22  ;;  %v1991_v15 = vpop.f32.mrb[1].mxu0  ;;  %v2007_v48 = vpop.f32.mrb[1].mxu1 }
 0x645   : > { %v2022_v42 = vadd.f32 %v1991_v15, %v1911_v37  ;;  %v2026_v50 = vadd.f32 %v2007_v48, %v1915_v39  ;;  %v2966_v35 = vpop.f32.mrb[2].mxu0  ;;  %v2970_v7 = vpop.f32.mrb[2].mxu1 }
 0x646   : > { %2032 = vst.msk [vmem:[#allocation4 + $0x10] sm:$0xff] %vm1769_vm5, %v2024_v32  ;;  %2036 = vst.msk [vmem:[#allocation4 + $0x30] sm:$0xff] %vm1769_vm5, %v2028_v29  ;;  %v2025_v62 = vadd.f32 %v2966_v35, %v1914_v45  ;;  %v2029_v38 = vadd.f32 %v2970_v7, %v1918_v28  ;;  %v1994_v41 = vpop.f32.mrb[3].mxu0  ;;  %v2010_v53 = vpop.f32.mrb[3].mxu1 }
 0x647   : > { %2030 = vst.msk [vmem:[#allocation4] sm:$0xff] %vm1769_vm5, %v2022_v42  ;;  %2034 = vst.msk [vmem:[#allocation4 + $0x20] sm:$0xff] %vm1769_vm5, %v2026_v50  ;;  %v2023_v8 = vadd.f32 %v1994_v41, %v1912_v9  ;;  %v2027_v36 = vadd.f32 %v2010_v53, %v1916_v49 }
 0x648   : > { %2033 = vst.msk [vmem:[#allocation4 + $0x18] sm:$0xff] %vm1769_vm5, %v2025_v62  ;;  %2037 = vst.msk [vmem:[#allocation4 + $0x38] sm:$0xff] %vm1769_vm5, %v2029_v38 }
 0x649   : > { %2031 = vst.msk [vmem:[#allocation4 + $0x8] sm:$0xff] %vm1769_vm5, %v2023_v8  ;;  %2035 = vst.msk [vmem:[#allocation4 + $0x28] sm:$0xff] %vm1769_vm5, %v2027_v36 }
 0x64a PF: > { %v2084_v55 = vld [vmem:[%s4369_s5] sm:$0x3]  ;;  %vm2097_vm6 = vcmask 1041408   ;;  %s2195_s10 = sand.u32 1, %s4094_s28   ;;  %v2852_v47 = vld [vmem:[%s4371_s7 + $0x2] ss:$0 sm:$0xff] }
 0x64b   : > { %3005 = vmatprep.subr.msk.bf16.mxu0 %vm2097_vm6, %v2084_v55  ;;  %3006 = vmatprep.subr.msk.bf16.mxu1 %vm2097_vm6, %v2084_v55  ;;  %v2099_v43 = vsel %vm2097_vm6, %v2084_v55, 0  ;;  %v2846_v52 = vld [vmem:[%s4371_s7] ss:$0 sm:$0xff]  ;;  %v2847_v58 = vld [vmem:[%s4371_s7 + $0x1] ss:$0 sm:$0xff]  ;;  %s2196_s13 = ssub.s32 0, %s2195_s10 }
 0x64c   : > { %2972 = vmatpush3.bf16.msra.mxu0 %v2099_v43  ;;  %3000 = vmatpush3.bf16.msra.mxu1 %v2099_v43  ;;  %s4455_s13 = smov (!%p1662_p1, %s2196_s13), %s2195_s10  ;;  %v2853_v39 = vld [vmem:[%s4371_s7 + $0x3] ss:$0 sm:$0xff]  ;;  %s2286_s22 = sld [smem:[#allocation5]]  ;;  %vm2445_vm7 = vcmask 130112   ;;  %vm2452_vm8 = vcmask 195712   ;;  %vm2459_vm9 = vcmask 261312  }
 0x64d   : > { %v2040_v31 = vld [vmem:[#allocation4 + $0x10] sm:$0xff]  ;;  %s2878_s15 = sshll.u32 %s4455_s13, 5  ;;  %s2857_s8 = sld [smem:[#allocation5 + $0x1]]  ;;  %vm2466_vm10 = vcmask 326912   ;;  %vm2473_vm11 = vcmask 392512   ;;  %vm2480_vm12 = vcmask 458112  }
 0x64e   : > { %v2038_v14 = vld [vmem:[#allocation4] sm:$0xff]  ;;  %v2053_v10 = vmul.f32 %v2846_v52, %v2040_v31  ;;  %v2044_v12 = vld [vmem:[#allocation4 + $0x30] sm:$0xff]  ;;  %s2200_s27 = scalar_lea.vmem [#allocation3], %s2878_s15  ;;  %s2858_s11 = sld [smem:[#allocation5 + $0x2]]  ;;  %vm2487_vm13 = vcmask 523712   ;;  %vm2490_vm14 = vcmask 516096  }
 0x64f   : > { %v2042_v51 = vld [vmem:[#allocation4 + $0x20] sm:$0xff]  ;;  %v2051_v59 = vmul.f32 %v2846_v52, %v2038_v14  ;;  %v2041_v40 = vld [vmem:[#allocation4 + $0x18] sm:$0xff]  ;;  %v2057_v17 = vmul.f32 %v2846_v52, %v2044_v12  ;;  %v2202_v22 = vld [vmem:[%s2200_s27 + $0x8] sm:$0xff]  ;;  %s2859_s23 = sld [smem:[#allocation5 + $0x3]]  ;;  %s2535_s26 = sshll.u32 %s3494_s29, 4  ;;  %s4310_s26 = int_to_ptr.vmem [resolvable:$true] %s2535_s26 }
 0x650   : > { %v2039_v54 = vld [vmem:[#allocation4 + $0x8] sm:$0xff]  ;;  %v2055_v21 = vmul.f32 %v2846_v52, %v2042_v51  ;;  %v2054_v20 = vmul.f32 %v2846_v52, %v2041_v40  ;;  %v2045_v13 = vld [vmem:[#allocation4 + $0x38] sm:$0xff]  ;;  %v2066_v23 = vadd.f32 %v2847_v58, %v2053_v10  ;;  %v2201_v3 = vld [vmem:[%s2200_s27] sm:$0xff]  ;;  %v2207_v28 = vunpack.c.l.bf16 %v2202_v22  ;;  %s4421_s13 = sld [smem:[#allocation25_spill]]  ;;  %s4423_s17 = sand.u32 1, %s3259_s14  }
 0x651   : > { %v2052_v60 = vmul.f32 %v2846_v52, %v2039_v54  ;;  %v2043_v61 = vld [vmem:[#allocation4 + $0x28] sm:$0xff]  ;;  %v2064_v56 = vadd.f32 %v2847_v58, %v2051_v59  ;;  %v2058_v26 = vmul.f32 %v2846_v52, %v2045_v13  ;;  %v2070_v1 = vadd.f32 %v2847_v58, %v2057_v17  ;;  %v2204_v11 = vld [vmem:[%s2200_s27 + $0x18] sm:$0xff]  ;;  %v2203_v48 = vld [vmem:[%s2200_s27 + $0x10] sm:$0xff]  ;;  %s2518_s19 = scalar_lea.sflag [#allocation6], %s4423_s17  ;;  %s3185_s25 = scalar_lea.vmem %s4310_s26, 16 }
 0x652   : > { %v2056_v4 = vmul.f32 %v2846_v52, %v2043_v61  ;;  %v2068_v46 = vadd.f32 %v2847_v58, %v2055_v21  ;;  %v2067_v16 = vadd.f32 %v2847_v58, %v2054_v20  ;;  %v2074_v2 = vmax.f32 %v2066_v23, 0.0  ;;  %p3186_p6 = scmp.ne.s32.totalorder %s4310_s26, %s3185_s25 }
 0x653   : > { %v2065_v18 = vadd.f32 %v2847_v58, %v2052_v60  ;;  %v2072_v63 = vmax.f32 %v2064_v56, 0.0  ;;  %v2071_v25 = vadd.f32 %v2847_v58, %v2058_v26  ;;  %v2078_v27 = vmax.f32 %v2070_v1, 0.0 }
 0x654   : > { %v2069_v19 = vadd.f32 %v2847_v58, %v2056_v4  ;;  %v2076_v44 = vmax.f32 %v2068_v46, 0.0  ;;  %v2075_v5 = vmax.f32 %v2067_v16, 0.0  ;;  %v2211_v50 = vunpack.c.l.bf16 %v2204_v11  ;;  %p3187_p7 = pnand %p3186_p6, %p3411_p3 }
 0x655   : > { %v2073_v0 = vmax.f32 %v2065_v18, 0.0  ;;  %v2079_v6 = vmax.f32 %v2071_v25, 0.0  ;;  %v2205_v35 = vunpack.c.l.bf16 %v2201_v3  ;;  %v2209_v55 = vunpack.c.l.bf16 %v2203_v48 }
 0x656   : > { %v2077_v24 = vmax.f32 %v2069_v19, 0.0  ;;  %v2081_v34 = vpack.c.bf16 %v2075_v5, %v2074_v2  ;;  %v2208_v59 = vunpack.c.h.bf16 %v2202_v22  ;;  %v2212_v46 = vunpack.c.h.bf16 %v2204_v11  ;;  %s4422_s27 = smov %s4421_s13  ;;  %p3188_p9 = pneg %p3187_p7 }
 0x657   : > { %v2080_v30 = vpack.c.bf16 %v2073_v0, %v2072_v63  ;;  %v2083_v33 = vpack.c.bf16 %v2079_v6, %v2078_v27  ;;  %v2206_v23 = vunpack.c.h.bf16 %v2201_v3  ;;  %v2210_v5 = vunpack.c.h.bf16 %v2203_v48 }
 0x658   : > { %v2082_v57 = vpack.c.bf16 %v2077_v24, %v2076_v44  ;;  %v4231_v48 = vstv %s2857_s8 }
 0x659   : > { %2973 = vmatprep.mubr.msk.bf16.mxu0 %vm1769_vm5, %v2080_v30 }
 0x65a   : > { %2977 = vmatprep.mubr.msk.bf16.mxu1 %vm1769_vm5, %v2082_v57  ;;  %2974 = vmatmul.mubr.msk.bf16.vlgmr.msra.gmra.mrb[0].mxu0 %vm1769_vm5, %v2081_v34 }
 0x65b   : > { %2978 = vmatmul.mubr.msk.bf16.vlgmr.msra.gmra.mrb[0].mxu1 %vm1769_vm5, %v2083_v33 }
 0x72d   : > { %v2975_v37 = vpop.f32.mrb[0].mxu0 }
 0x72e   : > { %v2173_v45 = vmul.f32 %v2975_v37, %v2852_v47  ;;  %v2135_v32 = vpop.f32.mrb[1].mxu0  ;;  %v2979_v29 = vpop.f32.mrb[0].mxu1 }
 0x72f   : > { %v2171_v15 = vmul.f32 %v2852_v47, %v2135_v32  ;;  %v2976_v9 = vpop.f32.mrb[2].mxu0  ;;  %v2177_v42 = vmul.f32 %v2979_v29, %v2852_v47  ;;  %v2151_v7 = vpop.f32.mrb[1].mxu1  ;;  %v4229_v29 = vstv %s2286_s22 }
 0x730   : > { %v2186_v49 = vadd.f32 %v2853_v39, %v2173_v45  ;;  %v2138_v62 = vpop.f32.mrb[3].mxu0  ;;  %v2175_v41 = vmul.f32 %v2852_v47, %v2151_v7  ;;  %v2980_v53 = vpop.f32.mrb[2].mxu1  ;;  %v2174_v14 = vmul.f32 %v2976_v9, %v2852_v47  ;;  %v2868_v45 = vld [vmem:[%s481_s20] ss:$0 sm:$0xff]  ;;  %s4419_s20 = sld [smem:[#allocation13_spill]] }
 0x731   : > { %v2184_v38 = vadd.f32 %v2853_v39, %v2171_v15  ;;  %v2190_v36 = vadd.f32 %v2853_v39, %v2177_v42  ;;  %v2154_v54 = vpop.f32.mrb[3].mxu1  ;;  %v2178_v40 = vmul.f32 %v2980_v53, %v2852_v47  ;;  %v2172_v12 = vmul.f32 %v2852_v47, %v2138_v62 }
 0x732   : > { %v2215_v8 = vadd.f32 %v2207_v28, %v2186_v49  ;;  %v2188_v43 = vadd.f32 %v2853_v39, %v2175_v41  ;;  %v2187_v61 = vadd.f32 %v2853_v39, %v2174_v14  ;;  %v2176_v0 = vmul.f32 %v2852_v47, %v2154_v54 }
 0x733   : > { %v2219_v52 = vadd.f32 %v2211_v50, %v2190_v36  ;;  %v2213_v58 = vadd.f32 %v2205_v35, %v2184_v38  ;;  %v2191_v18 = vadd.f32 %v2853_v39, %v2178_v40  ;;  %v2185_v19 = vadd.f32 %v2853_v39, %v2172_v12 }
 0x734   : > { %v4176_v51 = vmax.f32 %v2215_v8, 0.0  ;;  %v2217_v60 = vadd.f32 %v2209_v55, %v2188_v43  ;;  %v2216_v20 = vadd.f32 %v2208_v59, %v2187_v61  ;;  %v2189_v2 = vadd.f32 %v2853_v39, %v2176_v0 }
 0x735   : > { %v4178_v21 = vmax.f32 %v2219_v52, 0.0  ;;  %v4184_v10 = vmax.f32 %v2213_v58, 0.0  ;;  %v2220_v63 = vadd.f32 %v2212_v46, %v2191_v18  ;;  %v2214_v1 = vadd.f32 %v2206_v23, %v2185_v19 }
 0x736   : > { %v2235_v31 = vsel %vm1769_vm5, %v4176_v51, 0.0  ;;  %v2268_v13 = vsel %vm1769_vm5, %v4176_v51, -inf  ;;  %v4188_v56 = vmax.f32 %v2217_v60, 0.0  ;;  %v4194_v26 = vmax.f32 %v2216_v20, 0.0  ;;  %s2869_s24 = sshll.u32 %s4419_s20, 2 }
 0x737   : > { %2236 = vadd.xlane.f32.xlu1 %v2235_v31  ;;  %v2247_v4 = vsel %vm1769_vm5, %v4178_v21, 0.0  ;;  %v2229_v17 = vsel %vm1769_vm5, %v4184_v10, 0.0  ;;  %v2262_v44 = vsel %vm1769_vm5, %v4184_v10, -inf  ;;  %v4202_v30 = vmax.f32 %v2220_v63, 0.0  ;;  %s2531_s21 = sadd.s32 %s3267_s16, %s2869_s24 }
 0x738   : > { %2248 = vadd.xlane.f32.xlu0 %v2247_v4  ;;  %v2274_v16 = vsel %vm1769_vm5, %v4188_v56, -inf  ;;  %v2238_v24 = vsel %vm1769_vm5, %v4194_v26, 0.0  ;;  %v2241_v25 = vsel %vm1769_vm5, %v4188_v56, 0.0  ;;  %v2271_v27 = vsel %vm1769_vm5, %v4194_v26, -inf  ;;  %s2870_s16 = sshll.u32 %s2531_s21, 4 }
 0x739   : > { %v4206_v57 = vmax.f32 %v2214_v1, 0.0  ;;  %v2218_v34 = vadd.f32 %v2210_v5, %v2189_v2  ;;  %v2250_v6 = vsel %vm1769_vm5, %v4202_v30, 0.0  ;;  %v2283_v37 = vsel %vm1769_vm5, %v4202_v30, -inf  ;;  %s4308_s15 = scalar_lea.hbm %s4421_s13, %s2870_s16 }
 0x73a   : > { %v2280_v3 = vsel %vm1769_vm5, %v4178_v21, -inf  ;;  %v4235_v50 = vstv %s2858_s11  ;;  %v4237_v38 = vstv %s2859_s23 }
 0x73b   : > { %2269 = vmax.xlane.f32.xlu1 %v2268_v13  ;;  %v2265_v33 = vsel %vm1769_vm5, %v4206_v57, -inf  ;;  %v2232_v47 = vsel %vm1769_vm5, %v4206_v57, 0.0  ;;  %v4214_v22 = vmax.f32 %v2218_v34, 0.0 }
 0x73c   : > { %2230 = vadd.xlane.f32.xlu0 %v2229_v17 }
 0x73d   : > { %v2244_v39 = vsel %vm1769_vm5, %v4214_v22, 0.0  ;;  %v2277_v11 = vsel %vm1769_vm5, %v4214_v22, -inf }
 0x73f   : > { %2275 = vmax.xlane.f32.xlu1 %v2274_v16 }
 0x740   : > { %2263 = vmax.xlane.f32.xlu0 %v2262_v44 }
 0x743   : > { %2239 = vadd.xlane.f32.xlu1 %v2238_v24 }
 0x744   : > { %2242 = vadd.xlane.f32.xlu0 %v2241_v25 }
 0x747   : > { %2272 = vmax.xlane.f32.xlu1 %v2271_v27 }
 0x748   : > { %2251 = vadd.xlane.f32.xlu0 %v2250_v6 }
 0x74b   : > { %2266 = vmax.xlane.f32.xlu1 %v2265_v33 }
 0x74c   : > { %2233 = vadd.xlane.f32.xlu0 %v2232_v47 }
 0x74f   : > { %2284 = vmax.xlane.f32.xlu1 %v2283_v37 }
 0x750   : > { %2245 = vadd.xlane.f32.xlu0 %v2244_v39 }
 0x753   : > { %2278 = vmax.xlane.f32.xlu1 %v2277_v11 }
 0x754   : > { %2281 = vmax.xlane.f32.xlu0 %v2280_v3 }
 0x764   : > { %2392 = vbcast.lane.b32.xlu1 %v2868_v45, 264 }
 0x768   : > { %2396 = vbcast.lane.b32.xlu1 %v2868_v45, 272 }
 0x76a   : > { %2388 = vbcast.lane.b32.xlu0 %v2868_v45, 256 }
 0x76c   : > { %2400 = vbcast.lane.b32.xlu1 %v2868_v45, 280 }
 0x76e   : > { %2404 = vbcast.lane.b32.xlu0 %v2868_v45, 288 }
 0x770   : > { %2408 = vbcast.lane.b32.xlu1 %v2868_v45, 296 }
 0x772   : > { %2412 = vbcast.lane.b32.xlu0 %v2868_v45, 304 }
 0x774   : > { %2416 = vbcast.lane.b32.xlu1 %v2868_v45, 312 }
 0x7c4   : > { %v2237_v28 = vpop.xlane.xlu1 %2236 }
 0x7c5   : > { %v2256_v32 = vmul.f32 0.25, %v2237_v28  ;;  %v2249_v15 = vpop.xlane.xlu0 %2248 }
 0x7c6   : > { %v2260_v39 = vmul.f32 0.25, %v2249_v15 }
 0x7c7   : > { %v2290_v49 = vmul.f32 %v4229_v29, %v2256_v32 }
 0x7c8   : > { %v2270_v9 = vpop.xlane.xlu1 %2269  ;;  %v2294_v15 = vmul.f32 %v4229_v29, %v2260_v39 }
 0x7c9   : > { %v2300_v42 = vmul.f32 %v4231_v48, %v2270_v9  ;;  %v2231_v35 = vpop.xlane.xlu0 %2230 }
 0x7ca   : > { %v2254_v62 = vmul.f32 0.25, %v2231_v35 }
 0x7cb   : > { %v2308_v7 = vadd.f32 %v2300_v42, %v2290_v49 }
 0x7cc   : > { %v2276_v41 = vpop.xlane.xlu1 %2275  ;;  %v2288_v55 = vmul.f32 %v4229_v29, %v2254_v62 }
 0x7cd   : > { %v2318_v53 = vmul.f32 %v4235_v50, %v2308_v7  ;;  %v2264_v8 = vpop.xlane.xlu0 %2263  ;;  %v2302_v31 = vmul.f32 %v4231_v48, %v2276_v41 }
 0x7ce   : > { %v2298_v14 = vmul.f32 %v4231_v48, %v2264_v8 }
 0x7cf   : > { %v2328_v36 = vadd.f32 %v4237_v38, %v2318_v53 }
 0x7d0   : > { %v2240_v54 = vpop.xlane.xlu1 %2239  ;;  %v2306_v52 = vadd.f32 %v2298_v14, %v2288_v55 }
 0x7d1   : > { %v2862_v43 = vmul.f32 -1.442695, %v2328_v36  ;;  %v2257_v58 = vmul.f32 0.25, %v2240_v54  ;;  %v2243_v59 = vpop.xlane.xlu0 %2242 }
 0x7d2   : > { %v2316_v60 = vmul.f32 %v4235_v50, %v2306_v52  ;;  %v2258_v61 = vmul.f32 0.25, %v2243_v59 }
 0x7d3   : > { %3138 = vpow2.f32 %v2862_v43  ;;  %v2291_v12 = vmul.f32 %v4229_v29, %v2257_v58 }
 0x7d4   : > { %v2273_v40 = vpop.xlane.xlu1 %2272  ;;  %v2326_v4 = vadd.f32 %v4237_v38, %v2316_v60  ;;  %v2292_v20 = vmul.f32 %v4229_v29, %v2258_v61 }
 0x7d5   : > { %v2301_v13 = vmul.f32 %v4231_v48, %v2273_v40  ;;  %v2252_v18 = vpop.xlane.xlu0 %2251 }
 0x7d6   : > { %v2860_v46 = vmul.f32 -1.442695, %v2326_v4  ;;  %v2310_v17 = vadd.f32 %v2302_v31, %v2292_v20  ;;  %v2261_v23 = vmul.f32 0.25, %v2252_v18 }
 0x7d7   : > { %v2309_v19 = vadd.f32 %v2301_v13, %v2291_v12 }
 0x7d8   : > { %v2267_v16 = vpop.xlane.xlu1 %2266  ;;  %3140 = vpow2.f32 %v2860_v46  ;;  %v2320_v63 = vmul.f32 %v4235_v50, %v2310_v17  ;;  %v2295_v5 = vmul.f32 %v4229_v29, %v2261_v23 }
 0x7d9   : > { %v2319_v0 = vmul.f32 %v4235_v50, %v2309_v19  ;;  %v2234_v44 = vpop.xlane.xlu0 %2233  ;;  %v2299_v25 = vmul.f32 %v4231_v48, %v2267_v16 }
 0x7da   : > { %v2330_v1 = vadd.f32 %v4237_v38, %v2320_v63  ;;  %v2255_v2 = vmul.f32 0.25, %v2234_v44 }
 0x7db   : > { %v2329_v24 = vadd.f32 %v4237_v38, %v2319_v0  ;;  %v2434_v0 = vlaneseq }
 0x7dc   : > { %v2285_v27 = vpop.xlane.xlu1 %2284  ;;  %v2864_v6 = vmul.f32 -1.442695, %v2330_v1  ;;  %v2289_v47 = vmul.f32 %v4229_v29, %v2255_v2 }
 0x7dd   : > { %v3139_v34 = vpop.eup %3138  ;;  %v2863_v33 = vmul.f32 -1.442695, %v2329_v24  ;;  %v2305_v37 = vmul.f32 %v4231_v48, %v2285_v27  ;;  %v2246_v3 = vpop.xlane.xlu0 %2245  ;;  %v2435_v2 = vand.u32 127, %v2434_v0 }
 0x7de   : > { %v2360_v11 = vadd.f32 1.0, %v3139_v34  ;;  %3142 = vpow2.f32 %v2864_v6  ;;  %v2307_v45 = vadd.f32 %v2299_v25, %v2289_v47  ;;  %v2259_v32 = vmul.f32 0.25, %v2246_v3 }
 0x7df   : > { %v2313_v28 = vadd.f32 %v2305_v37, %v2295_v5  ;;  %v2440_v37 = vadd.s32 4294967288, %v2435_v2 }
 0x7e0   : > { %3144 = vrcp.f32 %v2360_v11  ;;  %v2279_v9 = vpop.xlane.xlu1 %2278  ;;  %v2317_v49 = vmul.f32 %v4235_v50, %v2307_v45  ;;  %v2293_v35 = vmul.f32 %v4229_v29, %v2259_v32  ;;  %v2447_v11 = vadd.s32 4294967280, %v2435_v2 }
 0x7e1   : > { %3146 = vpow2.f32 %v2863_v33  ;;  %v2323_v42 = vmul.f32 %v4235_v50, %v2313_v28  ;;  %v2303_v7 = vmul.f32 %v4231_v48, %v2279_v9  ;;  %v2282_v62 = vpop.xlane.xlu0 %2281  ;;  %v2454_v45 = vadd.s32 4294967272, %v2435_v2 }
 0x7e2   : > { %v3141_v41 = vpop.eup %3140  ;;  %v2327_v53 = vadd.f32 %v4237_v38, %v2317_v49  ;;  %v2304_v36 = vmul.f32 %v4231_v48, %v2282_v62  ;;  %v2461_v32 = vadd.s32 4294967264, %v2435_v2 }
 0x7e3   : > { %v2333_v8 = vadd.f32 %v4237_v38, %v2323_v42  ;;  %v2358_v55 = vadd.f32 1.0, %v3141_v41  ;;  %v2311_v14 = vadd.f32 %v2303_v7, %v2293_v35  ;;  %v2468_v41 = vadd.s32 4294967256, %v2435_v2 }
 0x7e4   : > { %v4265_v54 = vpop.permute.xlu1 %2392  ;;  %v2861_v43 = vmul.f32 -1.442695, %v2327_v53  ;;  %v2312_v58 = vadd.f32 %v2304_v36, %v2294_v15  ;;  %v2475_v36 = vadd.s32 4294967248, %v2435_v2 }
 0x7e5   : > { %v2867_v52 = vmul.f32 -1.442695, %v2333_v8  ;;  %3148 = vrcp.f32 %v2358_v55  ;;  %v2321_v59 = vmul.f32 %v4235_v50, %v2311_v14  ;;  %v2389_v17 = vpop.permute.xlu0 %2388 }
 0x7e6   : > { %3150 = vpow2.f32 %v2861_v43  ;;  %v2322_v60 = vmul.f32 %v4235_v50, %v2312_v58 }
 0x7e7   : > { %3152 = vpow2.f32 %v2867_v52  ;;  %v2331_v29 = vadd.f32 %v4237_v38, %v2321_v59 }
 0x7e8   : > { %v2397_v61 = vpop.permute.xlu1 %2396  ;;  %v3143_v31 = vpop.eup %3142  ;;  %v2332_v48 = vadd.f32 %v4237_v38, %v2322_v60 }
 0x7e9   : > { %v2865_v4 = vmul.f32 -1.442695, %v2331_v29  ;;  %v2362_v18 = vadd.f32 1.0, %v3143_v31  ;;  %v2405_v27 = vpop.permute.xlu0 %2404 }
 0x7ea   : > { %v3145_v40 = vpop.eup %3144  ;;  %v2866_v12 = vmul.f32 -1.442695, %v2332_v48 }
 0x7eb   : > { %v3147_v20 = vpop.eup %3146  ;;  %v4271_v13 = vmul.f32 %v3145_v40, %v2397_v61  ;;  %3154 = vpow2.f32 %v2865_v4 }
 0x7ec   : > { %v2361_v46 = vadd.f32 1.0, %v3147_v20  ;;  %3156 = vpow2.f32 %v2866_v12  ;;  %v2401_v16 = vpop.permute.xlu1 %2400 }
 0x7ed   : > { %v2494_v50 = vmul.f32 %v4271_v13, %v4176_v51  ;;  %v2413_v60 = vpop.permute.xlu0 %2412 }
 0x7ee   : > { %3158 = vrcp.f32 %v2361_v46 }
 0x7ef   : > { %2502 = vst.msk [vmem:[%s3490_s12 + $0x10] sm:$0xff] %vm1769_vm5, %v2494_v50  ;;  %3160 = vrcp.f32 %v2362_v18  ;;  %v3149_v38 = vpop.eup %3148 }
 0x7f0   : > { %v3151_v19 = vpop.eup %3150  ;;  %v2418_v23 = vmul.f32 %v3149_v38, %v2389_v17  ;;  %v2409_v34 = vpop.permute.xlu1 %2408 }
 0x7f1   : > { %v3153_v63 = vpop.eup %3152  ;;  %v2359_v44 = vadd.f32 1.0, %v3151_v19 }
 0x7f2   : > { %v2365_v1 = vadd.f32 1.0, %v3153_v63  ;;  %v2492_v24 = vmul.f32 %v2418_v23, %v4184_v10  ;;  %v2437_v10 = vshrl.u32 %v2434_v0, 7 }
 0x7f3   : > { %3162 = vrcp.f32 %v2359_v44 }
 0x7f4   : > { %3164 = vrcp.f32 %v2365_v1  ;;  %2500 = vst.msk [vmem:[%s3490_s12] sm:$0xff] %vm1769_vm5, %v2492_v24  ;;  %v2443_v49 = vsub.s32 %v2440_v37, %v2437_v10  ;;  %v2438_v42 = vsub.s32 %v2435_v2, %v2437_v10  ;;  %v2417_v35 = vpop.permute.xlu1 %2416  ;;  %v2450_v62 = vsub.s32 %v2447_v11, %v2437_v10 }
 0x7f5   : > { %v3155_v51 = vpop.eup %3154  ;;  %v2457_v8 = vsub.s32 %v2454_v45, %v2437_v10  ;;  %v2471_v59 = vsub.s32 %v2468_v41, %v2437_v10  ;;  %v2478_v48 = vsub.s32 %v2475_v36, %v2437_v10 }
 0x7f6   : > { %v3157_v5 = vpop.eup %3156  ;;  %v2363_v25 = vadd.f32 1.0, %v3155_v51  ;;  %v2439_v52 = vrot.slane %v2418_v23, %v2438_v42  ;;  %v2451_v58 = vrot.slane %v4271_v13, %v2450_v62 }
 0x7f7   : > { %v2364_v33 = vadd.f32 1.0, %v3157_v5 }
 0x7f8   : > { %v3159_v6 = vpop.eup %3158  ;;  %3166 = vrcp.f32 %v2363_v25 }
 0x7f9   : > { %v3161_v47 = vpop.eup %3160  ;;  %v2421_v39 = vmul.f32 %v3159_v6, %v2401_v16  ;;  %3168 = vrcp.f32 %v2364_v33 }
 0x7fa   : > { %v2422_v3 = vmul.f32 %v3161_v47, %v2405_v27 }
 0x7fb   : > { %v2495_v28 = vmul.f32 %v2421_v39, %v4194_v26  ;;  %v2464_v26 = vsub.s32 %v2461_v32, %v2437_v10  ;;  %v2458_v31 = vrot.slane %v2421_v39, %v2457_v8 }
 0x7fc   : > { %v2496_v9 = vmul.f32 %v2422_v3, %v4188_v56  ;;  %v2482_v56 = vadd.s32 4294967240, %v2435_v2 }
 0x7fd   : > { %2503 = vst.msk [vmem:[%s3490_s12 + $0x18] sm:$0xff] %vm1769_vm5, %v2495_v28  ;;  %v3163_v7 = vpop.eup %3162  ;;  %v2465_v12 = vrot.slane %v2422_v3, %v2464_v26 }
 0x7fe   : > { %2504 = vst.msk [vmem:[%s3490_s12 + $0x20] sm:$0xff] %vm1769_vm5, %v2496_v9  ;;  %v3165_v15 = vpop.eup %3164  ;;  %v2419_v53 = vmul.f32 %v3163_v7, %v4265_v54  ;;  %v2485_v20 = vsub.s32 %v2482_v56, %v2437_v10 }
 0x7ff   : > { %v2425_v55 = vmul.f32 %v3165_v15, %v2417_v35 }
 0x800   : > { %v2444_v14 = vrot.slane %v2419_v53, %v2443_v49  ;;  %v2493_v43 = vmul.f32 %v2419_v53, %v4206_v57 }
 0x801   : > { %v2499_v54 = vmul.f32 %v2425_v55, %v4202_v30  ;;  %v2486_v23 = vrot.slane %v2425_v55, %v2485_v20 }
 0x802   : > { %v3167_v29 = vpop.eup %3166  ;;  %2501 = vst.msk [vmem:[%s3490_s12 + $0x8] sm:$0xff] %vm1769_vm5, %v2493_v43  ;;  %v2446_v61 = vsel %vm2445_vm7, %v2444_v14, %v2439_v52 }
 0x803   : > { %v3169_v57 = vpop.eup %3168  ;;  %v2453_v40 = vsel %vm2452_vm8, %v2451_v58, %v2446_v61  ;;  %v2423_v4 = vmul.f32 %v3167_v29, %v2409_v34  ;;  %2507 = vst.msk [vmem:[%s3490_s12 + $0x38] sm:$0xff] %vm1769_vm5, %v2499_v54 }
 0x804   : > { %v2460_v30 = vsel %vm2459_vm9, %v2458_v31, %v2453_v40  ;;  %v2424_v13 = vmul.f32 %v3169_v57, %v2413_v60 }
 0x805   : > { %v2472_v18 = vrot.slane %v2423_v4, %v2471_v59  ;;  %v2497_v46 = vmul.f32 %v2423_v4, %v4214_v22  ;;  %v2467_v50 = vsel %vm2466_vm10, %v2465_v12, %v2460_v30 }
 0x806   : > { %v2479_v17 = vrot.slane %v2424_v13, %v2478_v48  ;;  %v2498_v38 = vmul.f32 %v2424_v13, %v4178_v21 }
 0x807   : > { %v2474_v19 = vsel %vm2473_vm11, %v2472_v18, %v2467_v50  ;;  %2505 = vst.msk [vmem:[%s3490_s12 + $0x28] sm:$0xff] %vm1769_vm5, %v2497_v46 }
 0x808   : > { %2506 = vst.msk [vmem:[%s3490_s12 + $0x30] sm:$0xff] %vm1769_vm5, %v2498_v38  ;;  %v2481_v16 = vsel %vm2480_vm12, %v2479_v17, %v2474_v19  ;;  %s3303_s12 = smov [#allocation8]  }
 0x809   : > { %v2488_v21 = vsel %vm2487_vm13, %v2486_v23, %v2481_v16  ;;  %s3189_s18 = sshll.u32 %s3303_s12, 4  ;;  %s3190_s18 = int_to_ptr.vmem [resolvable:$false] %s3189_s18 }
 0x80a   : > { %2491 = vst.msk [vmem:[%s3494_s29] sm:$0x1] %vm2490_vm14, %v2488_v21  ;;  %s3191_s28 = scalar_lea.vmem %s3190_s18, 32  ;;  %p3192_p8 = scmp.lt.s32.totalorder %s4310_s26, %s3190_s18 }
 0x80b   : > { %p3193_p10 = scmp.lt.s32.totalorder %s3191_s28, %s3185_s25 }
 0x80d   : > { %p3194_p11 = por %p3193_p10, %p3192_p8 }
 0x80f   : > { %p3195_p12 = pnand %p3194_p11, %p3188_p9 }
 0x811   : > { %3198 = shalt.err (!%p3195_p12)
}
 0x812   : > { %s3199_s29 = scalar_lea.hbm %s4308_s15, 16  ;;  %s3203_s8 = scalar_lea.hbm %s4422_s27, 128 }
 0x813   : > { %p3200_p13 = scmp.ne.s32.totalorder %s4308_s15, %s3199_s29  ;;  %p3204_p2 = scmp.lt.u32.totalorder %s4308_s15, %s4422_s27 }
 0x814   : > { %p3205_p4 = scmp.lt.u32.totalorder %s3203_s8, %s3199_s29  ;;  %p3207_p6 = scmp.lt.u32.totalorder %s3199_s29, %s4308_s15 }
 0x815   : > { %p3201_p0 = pnand %p3200_p13, %p3411_p3 }
 0x816   : > { %p3206_p5 = por %p3205_p4, %p3204_p2 }
 0x817   : > { %p3202_p1 = pneg %p3201_p0 }
 0x818   : > { %p3208_p7 = por %p3207_p6, %p3206_p5 }
 0x81a   : > { %p3209_p9 = pnand %p3208_p7, %p3202_p1 }
 0x81c   : > { %3212 = shalt.err (!%p3209_p9)
}
 0x81d   : > { %3014 = dma.vmem_to_hbm [thread:$0]  (%p3411_p3), %s4310_s26, 16, %s4308_s15, %s2518_s19  }
 0x81e PF: > { %s4424_s20 = sld [smem:[#allocation16_spill]]  ;;  %s4425_s24 = sld [smem:[#allocation11_spill]] }
 0x81f   : > { %s4426_s21 = sld [smem:[#allocation20_spill]] }
 0x824   : > { %p3026_p8 = scmp.ge.s32.totalorder %s4424_s20, 2  ;;  %s2559_s16 = sand.u32 1, %s4425_s24  }
 0x825   : > { %p4427_p10 = scmp.ne.s32.totalorder %s4426_s21, 0  ;;  %s2560_s6 = scalar_lea.sflag [#allocation6], %s2559_s16 }
 0x827   : > { %p3021_p11 = pnand %p3026_p8, %p4427_p10 }
 0x829   : > { %3250 = dma.done.wait (!%p3021_p11), %s2560_s6, 16  }
 0x82a   : > { %3252 = vsyncadd (!%p3021_p11), %s2560_s6, 4294967280  ;;  %s25_s20 = sadd.s32 1, %s4424_s20   ;;  %s4428_s10 = sld [smem:[#allocation12_spill]] }
 0x82b   : > { %p22_p12 = scmp.ge.s32.totalorder %s25_s20, 10   ;;  %s4429_s15 = sld [smem:[#allocation21_spill]] }
 0x82c   : > { %s4430_s16 = sld [smem:[#allocation14_spill]]  ;;  %s4431_s17 = sld [smem:[#allocation15_spill]] }
 0x82d   : > { %s4432_s18 = sld [smem:[#allocation17_spill]]  ;;  %s4433_s19 = sld [smem:[#allocation19_spill]] }
 0x82e   : > { %s4434_s13 = smov %s3259_s14  ;;  %24 = sbr.rel (!%p22_p12) target bundleno = 11 (0xb), region = 138 }
 0x830   : > { %s4435_s14 = smov %s4428_s10 }
 0x835   :  { %2564 = vsyncpa [#allocation6], 1 }
 0x836   :  { %2566 = vsyncpa [#allocation6 + $0x1], 1 }
 0x837   :  { %2567 = vsyncpa [#allocation7], 1 }
 0x838   :  { %2569 = vsyncpa [#allocation7 + $0x1], 1 }

</bundles_post_ra>
